<compile_context>
chip_gen: v6e
topology: v6e:2x2x1
jax: 0.10.0
libtpu: 0.0.40
codegen_flags: <defaults>
</compile_context>

<pallas_src>
import functools

import numpy as np
import jax
import jax.numpy as jnp
from jax.experimental import pallas as pl
from jax.experimental.pallas import tpu as pltpu


def _round_up(a, b):
    return -(-a // b) * b


def _patch_embed_kernel(x_ref, wc_ref, pool_ref, wp_ref, bp_ref, o_ref,
                        slab_ref, y_ref, pooled_ref,
                        *, bblk, nCh, K1, t_chunk, n_chunks, Wp):
    C1, kdim_pad = wc_ref.shape
    mm_dtype = wc_ref.dtype
    krows = nCh * K1                       # real im2col rows
    n_slab = bblk * t_chunk                # batched matmul N (lane axis)
    xw = t_chunk + K1 - 1                  # input window per chunk

    # ---- per-step scratch setup -------------------------------------------
    # Scratch VMEM is uninitialized; pad rows must be zeroed (0 * NaN = NaN),
    # the bias row is constant 1.  These rows are never overwritten below.
    if kdim_pad > krows + 1:
        slab_ref[krows + 1:kdim_pad, :] = jnp.zeros(
            (kdim_pad - krows - 1, n_slab), mm_dtype)
    slab_ref[krows:krows + 1, :] = jnp.ones((1, n_slab), mm_dtype)
    pooled_ref[...] = jnp.zeros_like(pooled_ref)

    wc = wc_ref[...]                       # (40, kdim_pad) -- small, keep live

    @pl.loop(0, n_chunks)
    def _(c):
        t0 = pl.multiple_of(c * t_chunk, t_chunk)

        # -- batched im2col slab: one VMEM scratch for all bblk samples ------
        for b in range(bblk):              # bblk small; all offsets static
            # load the chunk once, cast once, then do the 25-way expansion
            xb = x_ref[b, :, pl.ds(t0, xw)].astype(mm_dtype)    # (nCh, xw)
            c0 = b * t_chunk
            for k in range(K1):
                slab_ref[k * nCh:(k + 1) * nCh, c0:c0 + t_chunk] = (
                    xb[:, k:k + t_chunk])

        # -- fused conv1 + conv2 + BN (+bias row): one wide MXU matmul -------
        out2 = jnp.dot(wc, slab_ref[...],
                       preferred_element_type=jnp.float32)       # (40, n_slab)
        # ELU (exp only on the non-positive branch -> no overflow)
        y_ref[...] = jnp.where(out2 > 0, out2,
                               jnp.exp(jnp.minimum(out2, 0.0)) - 1.0
                               ).astype(mm_dtype)

        # -- AvgPool chunk contribution (0/1 pool matrix; 1/75 folded into wp)
        pool_c = pool_ref[pl.ds(t0, t_chunk), :]                  # (t_chunk, Wp)
        for b in range(bblk):
            pooled_ref[:, b * Wp:(b + 1) * Wp] += jnp.dot(
                y_ref[:, b * t_chunk:(b + 1) * t_chunk], pool_c,
                preferred_element_type=jnp.float32)

    # Dropout(0.5): identity at inference.
    # TODO(synk): training-mode dropout RNG masking not implemented.

    # projection Conv2d(40, emb, (1,1)) once per grid step on the lane-dense
    # (emb, out_cols) slab (padding columns hold junk; sliced off outside).
    proj = jnp.dot(wp_ref[...], pooled_ref[...],
                   preferred_element_type=jnp.float32) + bp_ref[...]
    o_ref[0] = proj.astype(o_ref.dtype)


def _fold_shallownet(w1, b1, w2, b2, bn_scale, bn_shift):
    """Fold conv1 + conv2 + eval-mode BN into one (C1, nCh*K1) weight + bias."""
    C1, K1 = w1.shape
    nCh = w2.shape[0]
    # W[o,h,k] = sum_c w2[h,o,c] * w1[c,k]
    w_ohk = jnp.einsum('hoc,ck->ohk', w2, w1)                     # (C1, nCh, K1)
    # im2col rows are ordered (k, h) -> k*nCh + h
    w_comb = jnp.transpose(w_ohk, (0, 2, 1)).reshape(C1, K1 * nCh)
    w_comb = bn_scale * w_comb                                    # fold BN scale
    bias_pre = jnp.einsum('hoc,c->o', w2, b1[:, 0]) + b2[:, 0]    # (C1,)
    bias_comb = bn_scale[:, 0] * bias_pre + bn_shift[:, 0]        # (C1,)
    return w_comb, bias_comb


def _make_pool_ones(T1, T1_pad, k, s, Wp):
    """AvgPool2d((1,k),(1,s)) as a 0/1 matrix, rows padded to T1_pad."""
    P = np.zeros((T1_pad, Wp), np.float32)
    for w in range(Wp):
        P[w * s:w * s + k, w] = 1.0
    return jnp.asarray(P)


def patch_embedding_forward(x_nchw, params, *, bblk=None, t_chunk=512,
                            mxu_dtype=jnp.bfloat16, pool_k=75, pool_s=15):
    (w1, b1, w2, b2, bn_scale, bn_shift, _pool_mat, wp, bp) = params
    B, c_in, nCh, T = x_nchw.shape
    assert c_in == 1
    C1, K1 = w1.shape
    emb = wp.shape[0]
    T1 = T - K1 + 1
    Wp = (T1 - pool_k) // pool_s + 1
    assert Wp >= 1, "input too short for the (1,75)/(1,15) AvgPool"

    # fixed-width time chunks (multiple of 128); pad T1 up to n_chunks*t_chunk
    t_chunk = min(_round_up(t_chunk, 128), _round_up(T1, 128))
    n_chunks = -(-T1 // t_chunk)
    T1_pad = n_chunks * t_chunk
    T_pad = T1_pad + K1 - 1

    # fold conv1 + conv2 + BN; bias becomes an extra weight column matched by a
    # constant-ones slab row; pad the contraction dim to a multiple of 16.
    w_comb, bias_comb = _fold_shallownet(w1, b1, w2, b2, bn_scale, bn_shift)
    krows = nCh * K1
    kdim_pad = _round_up(krows + 1, 16)
    wc_full = jnp.zeros((C1, kdim_pad), jnp.float32)
    wc_full = wc_full.at[:, :krows].set(w_comb).at[:, krows].set(bias_comb)
    wc_full = wc_full.astype(mxu_dtype)

    # 0/1 pooling matrix (exact in bf16); 1/pool_k folded into the projection.
    pool_mat = _make_pool_ones(T1, T1_pad, pool_k, pool_s, Wp).astype(mxu_dtype)
    wp_scaled = (wp / float(pool_k)).astype(jnp.float32)   # projection stays f32
    bp_f32 = bp.astype(jnp.float32)

    x = x_nchw[:, 0].astype(jnp.float32)                   # (B, nCh, T)

    # batch block: amortize per-step overhead, keep grid >= 2 (both v7x TCs),
    # and bound the double-buffered x block's VMEM footprint (long-T safety).
    if bblk is None:
        bblk = max(1, min(8, B // 2))
        while bblk > 1 and 2 * bblk * nCh * T_pad * 4 > 24 * 1024 * 1024:
            bblk //= 2
    G = -(-B // bblk)
    B_pad = G * bblk

    x = jnp.pad(x, ((0, B_pad - B), (0, 0), (0, T_pad - T)))

    out_cols = _round_up(bblk * Wp, 128)                    # lane-dense output

    kernel = functools.partial(_patch_embed_kernel, bblk=bblk, nCh=nCh, K1=K1,
                               t_chunk=t_chunk, n_chunks=n_chunks, Wp=Wp)

    out = pl.pallas_call(
        kernel,
        out_shape=jax.ShapeDtypeStruct((G, emb, out_cols), jnp.float32),
        grid_spec=pltpu.PrefetchScalarGridSpec(
            num_scalar_prefetch=0,
            grid=(G,),
            in_specs=[
                pl.BlockSpec((bblk, nCh, T_pad), lambda g: (g, 0, 0)),
                pl.BlockSpec((C1, kdim_pad), lambda g: (0, 0)),
                pl.BlockSpec((T1_pad, Wp), lambda g: (0, 0)),
                pl.BlockSpec((emb, C1), lambda g: (0, 0)),
                pl.BlockSpec((emb, 1), lambda g: (0, 0)),
            ],
            out_specs=pl.BlockSpec((1, emb, out_cols), lambda g: (g, 0, 0)),
            scratch_shapes=[
                pltpu.VMEM((kdim_pad, bblk * t_chunk), mxu_dtype),  # im2col slab
                pltpu.VMEM((C1, bblk * t_chunk), mxu_dtype),        # ELU output
                pltpu.VMEM((C1, out_cols), jnp.float32),            # pooled acc
            ],
        ),
        compiler_params=pltpu.CompilerParams(
            dimension_semantics=("parallel",),
            vmem_limit_bytes=56 * 1024 * 1024),
    )(x, wc_full, pool_mat, wp_scaled, bp_f32)

    # 'b e (h) (w) -> b (h w) e' with h == 1  (drop lane padding, split blocks)
    out = out[:, :, :bblk * Wp].reshape(G, emb, bblk, Wp)
    out = jnp.transpose(out, (0, 2, 3, 1)).reshape(B_pad, Wp, emb)
    return out[:B]


def make_pool_matrix(T1, k=75, s=15):
    """Scaled AvgPool matrix (reference path only)."""
    Wp = (T1 - k) // s + 1
    P = np.zeros((T1, Wp), np.float32)
    for w in range(Wp):
        P[w * s:w * s + k, w] = 1.0 / k
    return jnp.asarray(P)


def init_params(key, nCh, T, emb_size=40, eps=1e-5):
    C1, K1 = 40, 25
    ks = jax.random.split(key, 9)
    # Conv2d(1, 40, (1, 25)) weight (40,1,1,25) -> (40,25)
    w1 = jax.random.normal(ks[0], (C1, K1), jnp.float32) * 0.1
    b1 = jax.random.normal(ks[1], (C1, 1), jnp.float32) * 0.1
    # Conv2d(40, 40, (nCh, 1)) weight (40,40,nCh,1) stored as (nCh, c_out, c_in)
    w2 = jax.random.normal(ks[2], (nCh, C1, C1), jnp.float32) * 0.1
    b2 = jax.random.normal(ks[3], (C1, 1), jnp.float32) * 0.1
    # BatchNorm2d(40), eval mode: fold (gamma, beta, running stats)
    gamma = 1.0 + 0.1 * jax.random.normal(ks[4], (C1, 1), jnp.float32)
    beta = 0.1 * jax.random.normal(ks[5], (C1, 1), jnp.float32)
    run_mean = 0.1 * jax.random.normal(ks[6], (C1, 1), jnp.float32)
    run_var = jnp.ones((C1, 1), jnp.float32)
    bn_scale = gamma / jnp.sqrt(run_var + eps)
    bn_shift = beta - run_mean * bn_scale
    # AvgPool2d((1,75),(1,15)) as a (T1, Wp) matrix (reference only)
    T1 = T - K1 + 1
    pool_mat = make_pool_matrix(T1)
    # projection Conv2d(40, emb, (1,1)) weight (emb,40,1,1) -> (emb,40)
    wp = jax.random.normal(ks[7], (emb_size, C1), jnp.float32) * 0.1
    bp = jax.random.normal(ks[8], (emb_size, 1), jnp.float32) * 0.1
    return (w1, b1, w2, b2, bn_scale, bn_shift, pool_mat, wp, bp)


def reference_forward(x_nchw, params):
    """Pure-JAX reference with the original (unfolded) op ordering."""
    w1, b1, w2, b2, bn_scale, bn_shift, pool_mat, wp, bp = params
    x = x_nchw[:, 0]                                          # (B, nCh, T)
    B, nCh, T = x.shape
    C1, K1 = w1.shape
    T1 = T - K1 + 1
    patches = jnp.stack([x[:, :, k:k + T1] for k in range(K1)], axis=2)
    out1 = jnp.einsum('ck,bhkt->bcht', w1, patches) + b1[None, :, :, None]
    out2 = jnp.einsum('hoi,biht->bot', w2, out1) + b2[None]
    y = out2 * bn_scale[None] + bn_shift[None]
    y = jnp.where(y > 0, y, jnp.exp(jnp.minimum(y, 0.0)) - 1.0)
    pooled = jnp.einsum('bct,tw->bcw', y, pool_mat)
    proj = jnp.einsum('ec,bcw->bew', wp, pooled) + bp[None]
    return jnp.transpose(proj, (0, 2, 1))


if __name__ == "__main__":
    B, nCh, T, emb = 4, 4, 128, 40    # module input (NCHW): (B, 1, nCh, T)
    key = jax.random.PRNGKey(0)
    kx, kp = jax.random.split(key)
    x = jax.random.normal(kx, (B, 1, nCh, T), jnp.float32)
    params = init_params(kp, nCh, T, emb)

    ref = jax.block_until_ready(reference_forward(x, params))

    # f32 MXU-operand path (tight check against the unfolded reference).
    out_f32 = jax.block_until_ready(
        patch_embedding_forward(x, params, mxu_dtype=jnp.float32))
    np.testing.assert_allclose(np.asarray(out_f32), np.asarray(ref),
                               rtol=2e-3, atol=2e-3)

    # bf16 MXU-operand path (default; f32 accumulation), looser tolerance.
    out_bf16 = jax.block_until_ready(patch_embedding_forward(x, params))
    np.testing.assert_allclose(np.asarray(out_bf16), np.asarray(ref),
                               rtol=5e-2, atol=5e-2)

    Wp = (T - 25 + 1 - 75) // 15 + 1
    assert out_f32.shape == (B, Wp, emb)
    print("KERNEL_OK")
</pallas_src>

<mosaic_0001>
module attributes {stable_mosaic.version = 11 : i64} {
  func.func @_patch_embed_kernel(%arg0: i32, %arg1: memref<2x4x152xf32, #tpu.memory_space<vmem>>, %arg2: memref<40x112xf32, #tpu.memory_space<vmem>>, %arg3: memref<128x2xf32, #tpu.memory_space<vmem>>, %arg4: memref<40x40xf32, #tpu.memory_space<vmem>>, %arg5: memref<40x1xf32, #tpu.memory_space<vmem>>, %arg6: memref<1x40x128xf32, #tpu.memory_space<vmem>>, %arg7: memref<112x256xf32, #tpu.memory_space<vmem>>, %arg8: memref<40x256xf32, #tpu.memory_space<vmem>>, %arg9: memref<40x128xf32, #tpu.memory_space<vmem>>) attributes {dimension_semantics = [#tpu.dimension_semantics<parallel>], iteration_bounds = array<i64: 2>, scalar_prefetch = 0 : i64, scratch_operands = 3 : i64, tpu.core_type = #tpu.core_type<tc>, window_params = [{transform_indices = @transform_0, window_bounds = array<i64: 2, 4, 152>}, {pipeline_mode = #tpu.pipeline_mode<synchronous>, transform_indices = @transform_1, window_bounds = array<i64: 40, 112>}, {pipeline_mode = #tpu.pipeline_mode<synchronous>, transform_indices = @transform_2, window_bounds = array<i64: 128, 2>}, {pipeline_mode = #tpu.pipeline_mode<synchronous>, transform_indices = @transform_3, window_bounds = array<i64: 40, 40>}, {pipeline_mode = #tpu.pipeline_mode<synchronous>, transform_indices = @transform_4, window_bounds = array<i64: 40, 1>}, {transform_indices = @transform_5, window_bounds = array<i64: 1, 40, 128>}]} {
    %cst = arith.constant 0.000000e+00 : f32
    %0 = vector.broadcast %cst : f32 to vector<11x256xf32>
    %c101 = arith.constant 101 : index
    %c0 = arith.constant 0 : index
    %1 = vector.load %arg7[%c101, %c0] : memref<112x256xf32, #tpu.memory_space<vmem>>, vector<11x256xf32>
    tpu.vector_store %arg7[%c101, %c0], %0 {strides = array<i32>} : memref<112x256xf32, #tpu.memory_space<vmem>>, vector<11x256xf32>,
    %cst_0 = arith.constant 1.000000e+00 : f32
    %2 = vector.broadcast %cst_0 : f32 to vector<1x256xf32>
    %c100 = arith.constant 100 : index
    %c0_1 = arith.constant 0 : index
    %3 = vector.load %arg7[%c100, %c0_1] : memref<112x256xf32, #tpu.memory_space<vmem>>, vector<1x256xf32>
    tpu.vector_store %arg7[%c100, %c0_1], %2 {strides = array<i32>} : memref<112x256xf32, #tpu.memory_space<vmem>>, vector<1x256xf32>,
    %cst_2 = arith.constant 0.000000e+00 : f32
    %4 = vector.broadcast %cst_2 : f32 to vector<40x128xf32>
    %c0_3 = arith.constant 0 : index
    %c0_4 = arith.constant 0 : index
    %5 = vector.load %arg9[%c0_3, %c0_4] : memref<40x128xf32, #tpu.memory_space<vmem>>, vector<40x128xf32>
    tpu.vector_store %arg9[%c0_3, %c0_4], %4 {strides = array<i32>} : memref<40x128xf32, #tpu.memory_space<vmem>>, vector<40x128xf32>,
    %c0_5 = arith.constant 0 : index
    %c0_6 = arith.constant 0 : index
    %6 = vector.load %arg2[%c0_5, %c0_6] : memref<40x112xf32, #tpu.memory_space<vmem>>, vector<40x112xf32>
    %c0_i32 = arith.constant 0 : i32
    %c1_i32 = arith.constant 1 : i32
    %7 = arith.muli %c0_i32, %c1_i32 : i32
    %c0_i32_7 = arith.constant 0 : i32
    %8 = arith.addi %c0_i32_7, %7 : i32
    %c128_i32 = arith.constant 128 : i32
    %9 = arith.muli %8, %c128_i32 : i32
    %10 = tpu.assume_multiple %9, 128 : i32
    %c0_8 = arith.constant 0 : index
    %c0_9 = arith.constant 0 : index
    %11 = arith.index_cast %10 : i32 to index
    %12 = vector.load %arg1[%c0_8, %c0_9, %11] : memref<2x4x152xf32, #tpu.memory_space<vmem>>, vector<1x4x152xf32>
    %13 = vector.shape_cast %12 : vector<1x4x152xf32> to vector<4x152xf32>
    %14 = vector.extract_strided_slice %13 {offsets = [0, 0], sizes = [4, 128], strides = [1, 1]} : vector<4x152xf32> to vector<4x128xf32>
    %c0_10 = arith.constant 0 : index
    %c0_11 = arith.constant 0 : index
    %15 = vector.load %arg7[%c0_10, %c0_11] : memref<112x256xf32, #tpu.memory_space<vmem>>, vector<4x128xf32>
    tpu.vector_store %arg7[%c0_10, %c0_11], %14 {strides = array<i32>} : memref<112x256xf32, #tpu.memory_space<vmem>>, vector<4x128xf32>,
    %16 = vector.extract_strided_slice %13 {offsets = [0, 1], sizes = [4, 128], strides = [1, 1]} : vector<4x152xf32> to vector<4x128xf32>
    %c4 = arith.constant 4 : index
    %c0_12 = arith.constant 0 : index
    %17 = vector.load %arg7[%c4, %c0_12] : memref<112x256xf32, #tpu.memory_space<vmem>>, vector<4x128xf32>
    tpu.vector_store %arg7[%c4, %c0_12], %16 {strides = array<i32>} : memref<112x256xf32, #tpu.memory_space<vmem>>, vector<4x128xf32>,
    %18 = vector.extract_strided_slice %13 {offsets = [0, 2], sizes = [4, 128], strides = [1, 1]} : vector<4x152xf32> to vector<4x128xf32>
    %c8 = arith.constant 8 : index
    %c0_13 = arith.constant 0 : index
    %19 = vector.load %arg7[%c8, %c0_13] : memref<112x256xf32, #tpu.memory_space<vmem>>, vector<4x128xf32>
    tpu.vector_store %arg7[%c8, %c0_13], %18 {strides = array<i32>} : memref<112x256xf32, #tpu.memory_space<vmem>>, vector<4x128xf32>,
    %20 = vector.extract_strided_slice %13 {offsets = [0, 3], sizes = [4, 128], strides = [1, 1]} : vector<4x152xf32> to vector<4x128xf32>
    %c12 = arith.constant 12 : index
    %c0_14 = arith.constant 0 : index
    %21 = vector.load %arg7[%c12, %c0_14] : memref<112x256xf32, #tpu.memory_space<vmem>>, vector<4x128xf32>
    tpu.vector_store %arg7[%c12, %c0_14], %20 {strides = array<i32>} : memref<112x256xf32, #tpu.memory_space<vmem>>, vector<4x128xf32>,
    %22 = vector.extract_strided_slice %13 {offsets = [0, 4], sizes = [4, 128], strides = [1, 1]} : vector<4x152xf32> to vector<4x128xf32>
    %c16 = arith.constant 16 : index
    %c0_15 = arith.constant 0 : index
    %23 = vector.load %arg7[%c16, %c0_15] : memref<112x256xf32, #tpu.memory_space<vmem>>, vector<4x128xf32>
    tpu.vector_store %arg7[%c16, %c0_15], %22 {strides = array<i32>} : memref<112x256xf32, #tpu.memory_space<vmem>>, vector<4x128xf32>,
    %24 = vector.extract_strided_slice %13 {offsets = [0, 5], sizes = [4, 128], strides = [1, 1]} : vector<4x152xf32> to vector<4x128xf32>
    %c20 = arith.constant 20 : index
    %c0_16 = arith.constant 0 : index
    %25 = vector.load %arg7[%c20, %c0_16] : memref<112x256xf32, #tpu.memory_space<vmem>>, vector<4x128xf32>
    tpu.vector_store %arg7[%c20, %c0_16], %24 {strides = array<i32>} : memref<112x256xf32, #tpu.memory_space<vmem>>, vector<4x128xf32>,
    %26 = vector.extract_strided_slice %13 {offsets = [0, 6], sizes = [4, 128], strides = [1, 1]} : vector<4x152xf32> to vector<4x128xf32>
    %c24 = arith.constant 24 : index
    %c0_17 = arith.constant 0 : index
    %27 = vector.load %arg7[%c24, %c0_17] : memref<112x256xf32, #tpu.memory_space<vmem>>, vector<4x128xf32>
    tpu.vector_store %arg7[%c24, %c0_17], %26 {strides = array<i32>} : memref<112x256xf32, #tpu.memory_space<vmem>>, vector<4x128xf32>,
    %28 = vector.extract_strided_slice %13 {offsets = [0, 7], sizes = [4, 128], strides = [1, 1]} : vector<4x152xf32> to vector<4x128xf32>
    %c28 = arith.constant 28 : index
    %c0_18 = arith.constant 0 : index
    %29 = vector.load %arg7[%c28, %c0_18] : memref<112x256xf32, #tpu.memory_space<vmem>>, vector<4x128xf32>
    tpu.vector_store %arg7[%c28, %c0_18], %28 {strides = array<i32>} : memref<112x256xf32, #tpu.memory_space<vmem>>, vector<4x128xf32>,
    %30 = vector.extract_strided_slice %13 {offsets = [0, 8], sizes = [4, 128], strides = [1, 1]} : vector<4x152xf32> to vector<4x128xf32>
    %c32 = arith.constant 32 : index
    %c0_19 = arith.constant 0 : index
    %31 = vector.load %arg7[%c32, %c0_19] : memref<112x256xf32, #tpu.memory_space<vmem>>, vector<4x128xf32>
    tpu.vector_store %arg7[%c32, %c0_19], %30 {strides = array<i32>} : memref<112x256xf32, #tpu.memory_space<vmem>>, vector<4x128xf32>,
    %32 = vector.extract_strided_slice %13 {offsets = [0, 9], sizes = [4, 128], strides = [1, 1]} : vector<4x152xf32> to vector<4x128xf32>
    %c36 = arith.constant 36 : index
    %c0_20 = arith.constant 0 : index
    %33 = vector.load %arg7[%c36, %c0_20] : memref<112x256xf32, #tpu.memory_space<vmem>>, vector<4x128xf32>
    tpu.vector_store %arg7[%c36, %c0_20], %32 {strides = array<i32>} : memref<112x256xf32, #tpu.memory_space<vmem>>, vector<4x128xf32>,
    %34 = vector.extract_strided_slice %13 {offsets = [0, 10], sizes = [4, 128], strides = [1, 1]} : vector<4x152xf32> to vector<4x128xf32>
    %c40 = arith.constant 40 : index
    %c0_21 = arith.constant 0 : index
    %35 = vector.load %arg7[%c40, %c0_21] : memref<112x256xf32, #tpu.memory_space<vmem>>, vector<4x128xf32>
    tpu.vector_store %arg7[%c40, %c0_21], %34 {strides = array<i32>} : memref<112x256xf32, #tpu.memory_space<vmem>>, vector<4x128xf32>,
    %36 = vector.extract_strided_slice %13 {offsets = [0, 11], sizes = [4, 128], strides = [1, 1]} : vector<4x152xf32> to vector<4x128xf32>
    %c44 = arith.constant 44 : index
    %c0_22 = arith.constant 0 : index
    %37 = vector.load %arg7[%c44, %c0_22] : memref<112x256xf32, #tpu.memory_space<vmem>>, vector<4x128xf32>
    tpu.vector_store %arg7[%c44, %c0_22], %36 {strides = array<i32>} : memref<112x256xf32, #tpu.memory_space<vmem>>, vector<4x128xf32>,
    %38 = vector.extract_strided_slice %13 {offsets = [0, 12], sizes = [4, 128], strides = [1, 1]} : vector<4x152xf32> to vector<4x128xf32>
    %c48 = arith.constant 48 : index
    %c0_23 = arith.constant 0 : index
    %39 = vector.load %arg7[%c48, %c0_23] : memref<112x256xf32, #tpu.memory_space<vmem>>, vector<4x128xf32>
    tpu.vector_store %arg7[%c48, %c0_23], %38 {strides = array<i32>} : memref<112x256xf32, #tpu.memory_space<vmem>>, vector<4x128xf32>,
    %40 = vector.extract_strided_slice %13 {offsets = [0, 13], sizes = [4, 128], strides = [1, 1]} : vector<4x152xf32> to vector<4x128xf32>
    %c52 = arith.constant 52 : index
    %c0_24 = arith.constant 0 : index
    %41 = vector.load %arg7[%c52, %c0_24] : memref<112x256xf32, #tpu.memory_space<vmem>>, vector<4x128xf32>
    tpu.vector_store %arg7[%c52, %c0_24], %40 {strides = array<i32>} : memref<112x256xf32, #tpu.memory_space<vmem>>, vector<4x128xf32>,
    %42 = vector.extract_strided_slice %13 {offsets = [0, 14], sizes = [4, 128], strides = [1, 1]} : vector<4x152xf32> to vector<4x128xf32>
    %c56 = arith.constant 56 : index
    %c0_25 = arith.constant 0 : index
    %43 = vector.load %arg7[%c56, %c0_25] : memref<112x256xf32, #tpu.memory_space<vmem>>, vector<4x128xf32>
    tpu.vector_store %arg7[%c56, %c0_25], %42 {strides = array<i32>} : memref<112x256xf32, #tpu.memory_space<vmem>>, vector<4x128xf32>,
    %44 = vector.extract_strided_slice %13 {offsets = [0, 15], sizes = [4, 128], strides = [1, 1]} : vector<4x152xf32> to vector<4x128xf32>
    %c60 = arith.constant 60 : index
    %c0_26 = arith.constant 0 : index
    %45 = vector.load %arg7[%c60, %c0_26] : memref<112x256xf32, #tpu.memory_space<vmem>>, vector<4x128xf32>
    tpu.vector_store %arg7[%c60, %c0_26], %44 {strides = array<i32>} : memref<112x256xf32, #tpu.memory_space<vmem>>, vector<4x128xf32>,
    %46 = vector.extract_strided_slice %13 {offsets = [0, 16], sizes = [4, 128], strides = [1, 1]} : vector<4x152xf32> to vector<4x128xf32>
    %c64 = arith.constant 64 : index
    %c0_27 = arith.constant 0 : index
    %47 = vector.load %arg7[%c64, %c0_27] : memref<112x256xf32, #tpu.memory_space<vmem>>, vector<4x128xf32>
    tpu.vector_store %arg7[%c64, %c0_27], %46 {strides = array<i32>} : memref<112x256xf32, #tpu.memory_space<vmem>>, vector<4x128xf32>,
    %48 = vector.extract_strided_slice %13 {offsets = [0, 17], sizes = [4, 128], strides = [1, 1]} : vector<4x152xf32> to vector<4x128xf32>
    %c68 = arith.constant 68 : index
    %c0_28 = arith.constant 0 : index
    %49 = vector.load %arg7[%c68, %c0_28] : memref<112x256xf32, #tpu.memory_space<vmem>>, vector<4x128xf32>
    tpu.vector_store %arg7[%c68, %c0_28], %48 {strides = array<i32>} : memref<112x256xf32, #tpu.memory_space<vmem>>, vector<4x128xf32>,
    %50 = vector.extract_strided_slice %13 {offsets = [0, 18], sizes = [4, 128], strides = [1, 1]} : vector<4x152xf32> to vector<4x128xf32>
    %c72 = arith.constant 72 : index
    %c0_29 = arith.constant 0 : index
    %51 = vector.load %arg7[%c72, %c0_29] : memref<112x256xf32, #tpu.memory_space<vmem>>, vector<4x128xf32>
    tpu.vector_store %arg7[%c72, %c0_29], %50 {strides = array<i32>} : memref<112x256xf32, #tpu.memory_space<vmem>>, vector<4x128xf32>,
    %52 = vector.extract_strided_slice %13 {offsets = [0, 19], sizes = [4, 128], strides = [1, 1]} : vector<4x152xf32> to vector<4x128xf32>
    %c76 = arith.constant 76 : index
    %c0_30 = arith.constant 0 : index
    %53 = vector.load %arg7[%c76, %c0_30] : memref<112x256xf32, #tpu.memory_space<vmem>>, vector<4x128xf32>
    tpu.vector_store %arg7[%c76, %c0_30], %52 {strides = array<i32>} : memref<112x256xf32, #tpu.memory_space<vmem>>, vector<4x128xf32>,
    %54 = vector.extract_strided_slice %13 {offsets = [0, 20], sizes = [4, 128], strides = [1, 1]} : vector<4x152xf32> to vector<4x128xf32>
    %c80 = arith.constant 80 : index
    %c0_31 = arith.constant 0 : index
    %55 = vector.load %arg7[%c80, %c0_31] : memref<112x256xf32, #tpu.memory_space<vmem>>, vector<4x128xf32>
    tpu.vector_store %arg7[%c80, %c0_31], %54 {strides = array<i32>} : memref<112x256xf32, #tpu.memory_space<vmem>>, vector<4x128xf32>,
    %56 = vector.extract_strided_slice %13 {offsets = [0, 21], sizes = [4, 128], strides = [1, 1]} : vector<4x152xf32> to vector<4x128xf32>
    %c84 = arith.constant 84 : index
    %c0_32 = arith.constant 0 : index
    %57 = vector.load %arg7[%c84, %c0_32] : memref<112x256xf32, #tpu.memory_space<vmem>>, vector<4x128xf32>
    tpu.vector_store %arg7[%c84, %c0_32], %56 {strides = array<i32>} : memref<112x256xf32, #tpu.memory_space<vmem>>, vector<4x128xf32>,
    %58 = vector.extract_strided_slice %13 {offsets = [0, 22], sizes = [4, 128], strides = [1, 1]} : vector<4x152xf32> to vector<4x128xf32>
    %c88 = arith.constant 88 : index
    %c0_33 = arith.constant 0 : index
    %59 = vector.load %arg7[%c88, %c0_33] : memref<112x256xf32, #tpu.memory_space<vmem>>, vector<4x128xf32>
    tpu.vector_store %arg7[%c88, %c0_33], %58 {strides = array<i32>} : memref<112x256xf32, #tpu.memory_space<vmem>>, vector<4x128xf32>,
    %60 = vector.extract_strided_slice %13 {offsets = [0, 23], sizes = [4, 128], strides = [1, 1]} : vector<4x152xf32> to vector<4x128xf32>
    %c92 = arith.constant 92 : index
    %c0_34 = arith.constant 0 : index
    %61 = vector.load %arg7[%c92, %c0_34] : memref<112x256xf32, #tpu.memory_space<vmem>>, vector<4x128xf32>
    tpu.vector_store %arg7[%c92, %c0_34], %60 {strides = array<i32>} : memref<112x256xf32, #tpu.memory_space<vmem>>, vector<4x128xf32>,
    %62 = vector.extract_strided_slice %13 {offsets = [0, 24], sizes = [4, 128], strides = [1, 1]} : vector<4x152xf32> to vector<4x128xf32>
    %c96 = arith.constant 96 : index
    %c0_35 = arith.constant 0 : index
    %63 = vector.load %arg7[%c96, %c0_35] : memref<112x256xf32, #tpu.memory_space<vmem>>, vector<4x128xf32>
    tpu.vector_store %arg7[%c96, %c0_35], %62 {strides = array<i32>} : memref<112x256xf32, #tpu.memory_space<vmem>>, vector<4x128xf32>,
    %c1 = arith.constant 1 : index
    %c0_36 = arith.constant 0 : index
    %64 = arith.index_cast %10 : i32 to index
    %65 = vector.load %arg1[%c1, %c0_36, %64] : memref<2x4x152xf32, #tpu.memory_space<vmem>>, vector<1x4x152xf32>
    %66 = vector.shape_cast %65 : vector<1x4x152xf32> to vector<4x152xf32>
    %67 = vector.extract_strided_slice %66 {offsets = [0, 0], sizes = [4, 128], strides = [1, 1]} : vector<4x152xf32> to vector<4x128xf32>
    %c0_37 = arith.constant 0 : index
    %c128 = arith.constant 128 : index
    %68 = vector.load %arg7[%c0_37, %c128] : memref<112x256xf32, #tpu.memory_space<vmem>>, vector<4x128xf32>
    tpu.vector_store %arg7[%c0_37, %c128], %67 {strides = array<i32>} : memref<112x256xf32, #tpu.memory_space<vmem>>, vector<4x128xf32>,
    %69 = vector.extract_strided_slice %66 {offsets = [0, 1], sizes = [4, 128], strides = [1, 1]} : vector<4x152xf32> to vector<4x128xf32>
    %c4_38 = arith.constant 4 : index
    %c128_39 = arith.constant 128 : index
    %70 = vector.load %arg7[%c4_38, %c128_39] : memref<112x256xf32, #tpu.memory_space<vmem>>, vector<4x128xf32>
    tpu.vector_store %arg7[%c4_38, %c128_39], %69 {strides = array<i32>} : memref<112x256xf32, #tpu.memory_space<vmem>>, vector<4x128xf32>,
    %71 = vector.extract_strided_slice %66 {offsets = [0, 2], sizes = [4, 128], strides = [1, 1]} : vector<4x152xf32> to vector<4x128xf32>
    %c8_40 = arith.constant 8 : index
    %c128_41 = arith.constant 128 : index
    %72 = vector.load %arg7[%c8_40, %c128_41] : memref<112x256xf32, #tpu.memory_space<vmem>>, vector<4x128xf32>
    tpu.vector_store %arg7[%c8_40, %c128_41], %71 {strides = array<i32>} : memref<112x256xf32, #tpu.memory_space<vmem>>, vector<4x128xf32>,
    %73 = vector.extract_strided_slice %66 {offsets = [0, 3], sizes = [4, 128], strides = [1, 1]} : vector<4x152xf32> to vector<4x128xf32>
    %c12_42 = arith.constant 12 : index
    %c128_43 = arith.constant 128 : index
    %74 = vector.load %arg7[%c12_42, %c128_43] : memref<112x256xf32, #tpu.memory_space<vmem>>, vector<4x128xf32>
    tpu.vector_store %arg7[%c12_42, %c128_43], %73 {strides = array<i32>} : memref<112x256xf32, #tpu.memory_space<vmem>>, vector<4x128xf32>,
    %75 = vector.extract_strided_slice %66 {offsets = [0, 4], sizes = [4, 128], strides = [1, 1]} : vector<4x152xf32> to vector<4x128xf32>
    %c16_44 = arith.constant 16 : index
    %c128_45 = arith.constant 128 : index
    %76 = vector.load %arg7[%c16_44, %c128_45] : memref<112x256xf32, #tpu.memory_space<vmem>>, vector<4x128xf32>
    tpu.vector_store %arg7[%c16_44, %c128_45], %75 {strides = array<i32>} : memref<112x256xf32, #tpu.memory_space<vmem>>, vector<4x128xf32>,
    %77 = vector.extract_strided_slice %66 {offsets = [0, 5], sizes = [4, 128], strides = [1, 1]} : vector<4x152xf32> to vector<4x128xf32>
    %c20_46 = arith.constant 20 : index
    %c128_47 = arith.constant 128 : index
    %78 = vector.load %arg7[%c20_46, %c128_47] : memref<112x256xf32, #tpu.memory_space<vmem>>, vector<4x128xf32>
    tpu.vector_store %arg7[%c20_46, %c128_47], %77 {strides = array<i32>} : memref<112x256xf32, #tpu.memory_space<vmem>>, vector<4x128xf32>,
    %79 = vector.extract_strided_slice %66 {offsets = [0, 6], sizes = [4, 128], strides = [1, 1]} : vector<4x152xf32> to vector<4x128xf32>
    %c24_48 = arith.constant 24 : index
    %c128_49 = arith.constant 128 : index
    %80 = vector.load %arg7[%c24_48, %c128_49] : memref<112x256xf32, #tpu.memory_space<vmem>>, vector<4x128xf32>
    tpu.vector_store %arg7[%c24_48, %c128_49], %79 {strides = array<i32>} : memref<112x256xf32, #tpu.memory_space<vmem>>, vector<4x128xf32>,
    %81 = vector.extract_strided_slice %66 {offsets = [0, 7], sizes = [4, 128], strides = [1, 1]} : vector<4x152xf32> to vector<4x128xf32>
    %c28_50 = arith.constant 28 : index
    %c128_51 = arith.constant 128 : index
    %82 = vector.load %arg7[%c28_50, %c128_51] : memref<112x256xf32, #tpu.memory_space<vmem>>, vector<4x128xf32>
    tpu.vector_store %arg7[%c28_50, %c128_51], %81 {strides = array<i32>} : memref<112x256xf32, #tpu.memory_space<vmem>>, vector<4x128xf32>,
    %83 = vector.extract_strided_slice %66 {offsets = [0, 8], sizes = [4, 128], strides = [1, 1]} : vector<4x152xf32> to vector<4x128xf32>
    %c32_52 = arith.constant 32 : index
    %c128_53 = arith.constant 128 : index
    %84 = vector.load %arg7[%c32_52, %c128_53] : memref<112x256xf32, #tpu.memory_space<vmem>>, vector<4x128xf32>
    tpu.vector_store %arg7[%c32_52, %c128_53], %83 {strides = array<i32>} : memref<112x256xf32, #tpu.memory_space<vmem>>, vector<4x128xf32>,
    %85 = vector.extract_strided_slice %66 {offsets = [0, 9], sizes = [4, 128], strides = [1, 1]} : vector<4x152xf32> to vector<4x128xf32>
    %c36_54 = arith.constant 36 : index
    %c128_55 = arith.constant 128 : index
    %86 = vector.load %arg7[%c36_54, %c128_55] : memref<112x256xf32, #tpu.memory_space<vmem>>, vector<4x128xf32>
    tpu.vector_store %arg7[%c36_54, %c128_55], %85 {strides = array<i32>} : memref<112x256xf32, #tpu.memory_space<vmem>>, vector<4x128xf32>,
    %87 = vector.extract_strided_slice %66 {offsets = [0, 10], sizes = [4, 128], strides = [1, 1]} : vector<4x152xf32> to vector<4x128xf32>
    %c40_56 = arith.constant 40 : index
    %c128_57 = arith.constant 128 : index
    %88 = vector.load %arg7[%c40_56, %c128_57] : memref<112x256xf32, #tpu.memory_space<vmem>>, vector<4x128xf32>
    tpu.vector_store %arg7[%c40_56, %c128_57], %87 {strides = array<i32>} : memref<112x256xf32, #tpu.memory_space<vmem>>, vector<4x128xf32>,
    %89 = vector.extract_strided_slice %66 {offsets = [0, 11], sizes = [4, 128], strides = [1, 1]} : vector<4x152xf32> to vector<4x128xf32>
    %c44_58 = arith.constant 44 : index
    %c128_59 = arith.constant 128 : index
    %90 = vector.load %arg7[%c44_58, %c128_59] : memref<112x256xf32, #tpu.memory_space<vmem>>, vector<4x128xf32>
    tpu.vector_store %arg7[%c44_58, %c128_59], %89 {strides = array<i32>} : memref<112x256xf32, #tpu.memory_space<vmem>>, vector<4x128xf32>,
    %91 = vector.extract_strided_slice %66 {offsets = [0, 12], sizes = [4, 128], strides = [1, 1]} : vector<4x152xf32> to vector<4x128xf32>
    %c48_60 = arith.constant 48 : index
    %c128_61 = arith.constant 128 : index
    %92 = vector.load %arg7[%c48_60, %c128_61] : memref<112x256xf32, #tpu.memory_space<vmem>>, vector<4x128xf32>
    tpu.vector_store %arg7[%c48_60, %c128_61], %91 {strides = array<i32>} : memref<112x256xf32, #tpu.memory_space<vmem>>, vector<4x128xf32>,
    %93 = vector.extract_strided_slice %66 {offsets = [0, 13], sizes = [4, 128], strides = [1, 1]} : vector<4x152xf32> to vector<4x128xf32>
    %c52_62 = arith.constant 52 : index
    %c128_63 = arith.constant 128 : index
    %94 = vector.load %arg7[%c52_62, %c128_63] : memref<112x256xf32, #tpu.memory_space<vmem>>, vector<4x128xf32>
    tpu.vector_store %arg7[%c52_62, %c128_63], %93 {strides = array<i32>} : memref<112x256xf32, #tpu.memory_space<vmem>>, vector<4x128xf32>,
    %95 = vector.extract_strided_slice %66 {offsets = [0, 14], sizes = [4, 128], strides = [1, 1]} : vector<4x152xf32> to vector<4x128xf32>
    %c56_64 = arith.constant 56 : index
    %c128_65 = arith.constant 128 : index
    %96 = vector.load %arg7[%c56_64, %c128_65] : memref<112x256xf32, #tpu.memory_space<vmem>>, vector<4x128xf32>
    tpu.vector_store %arg7[%c56_64, %c128_65], %95 {strides = array<i32>} : memref<112x256xf32, #tpu.memory_space<vmem>>, vector<4x128xf32>,
    %97 = vector.extract_strided_slice %66 {offsets = [0, 15], sizes = [4, 128], strides = [1, 1]} : vector<4x152xf32> to vector<4x128xf32>
    %c60_66 = arith.constant 60 : index
    %c128_67 = arith.constant 128 : index
    %98 = vector.load %arg7[%c60_66, %c128_67] : memref<112x256xf32, #tpu.memory_space<vmem>>, vector<4x128xf32>
    tpu.vector_store %arg7[%c60_66, %c128_67], %97 {strides = array<i32>} : memref<112x256xf32, #tpu.memory_space<vmem>>, vector<4x128xf32>,
    %99 = vector.extract_strided_slice %66 {offsets = [0, 16], sizes = [4, 128], strides = [1, 1]} : vector<4x152xf32> to vector<4x128xf32>
    %c64_68 = arith.constant 64 : index
    %c128_69 = arith.constant 128 : index
    %100 = vector.load %arg7[%c64_68, %c128_69] : memref<112x256xf32, #tpu.memory_space<vmem>>, vector<4x128xf32>
    tpu.vector_store %arg7[%c64_68, %c128_69], %99 {strides = array<i32>} : memref<112x256xf32, #tpu.memory_space<vmem>>, vector<4x128xf32>,
    %101 = vector.extract_strided_slice %66 {offsets = [0, 17], sizes = [4, 128], strides = [1, 1]} : vector<4x152xf32> to vector<4x128xf32>
    %c68_70 = arith.constant 68 : index
    %c128_71 = arith.constant 128 : index
    %102 = vector.load %arg7[%c68_70, %c128_71] : memref<112x256xf32, #tpu.memory_space<vmem>>, vector<4x128xf32>
    tpu.vector_store %arg7[%c68_70, %c128_71], %101 {strides = array<i32>} : memref<112x256xf32, #tpu.memory_space<vmem>>, vector<4x128xf32>,
    %103 = vector.extract_strided_slice %66 {offsets = [0, 18], sizes = [4, 128], strides = [1, 1]} : vector<4x152xf32> to vector<4x128xf32>
    %c72_72 = arith.constant 72 : index
    %c128_73 = arith.constant 128 : index
    %104 = vector.load %arg7[%c72_72, %c128_73] : memref<112x256xf32, #tpu.memory_space<vmem>>, vector<4x128xf32>
    tpu.vector_store %arg7[%c72_72, %c128_73], %103 {strides = array<i32>} : memref<112x256xf32, #tpu.memory_space<vmem>>, vector<4x128xf32>,
    %105 = vector.extract_strided_slice %66 {offsets = [0, 19], sizes = [4, 128], strides = [1, 1]} : vector<4x152xf32> to vector<4x128xf32>
    %c76_74 = arith.constant 76 : index
    %c128_75 = arith.constant 128 : index
    %106 = vector.load %arg7[%c76_74, %c128_75] : memref<112x256xf32, #tpu.memory_space<vmem>>, vector<4x128xf32>
    tpu.vector_store %arg7[%c76_74, %c128_75], %105 {strides = array<i32>} : memref<112x256xf32, #tpu.memory_space<vmem>>, vector<4x128xf32>,
    %107 = vector.extract_strided_slice %66 {offsets = [0, 20], sizes = [4, 128], strides = [1, 1]} : vector<4x152xf32> to vector<4x128xf32>
    %c80_76 = arith.constant 80 : index
    %c128_77 = arith.constant 128 : index
    %108 = vector.load %arg7[%c80_76, %c128_77] : memref<112x256xf32, #tpu.memory_space<vmem>>, vector<4x128xf32>
    tpu.vector_store %arg7[%c80_76, %c128_77], %107 {strides = array<i32>} : memref<112x256xf32, #tpu.memory_space<vmem>>, vector<4x128xf32>,
    %109 = vector.extract_strided_slice %66 {offsets = [0, 21], sizes = [4, 128], strides = [1, 1]} : vector<4x152xf32> to vector<4x128xf32>
    %c84_78 = arith.constant 84 : index
    %c128_79 = arith.constant 128 : index
    %110 = vector.load %arg7[%c84_78, %c128_79] : memref<112x256xf32, #tpu.memory_space<vmem>>, vector<4x128xf32>
    tpu.vector_store %arg7[%c84_78, %c128_79], %109 {strides = array<i32>} : memref<112x256xf32, #tpu.memory_space<vmem>>, vector<4x128xf32>,
    %111 = vector.extract_strided_slice %66 {offsets = [0, 22], sizes = [4, 128], strides = [1, 1]} : vector<4x152xf32> to vector<4x128xf32>
    %c88_80 = arith.constant 88 : index
    %c128_81 = arith.constant 128 : index
    %112 = vector.load %arg7[%c88_80, %c128_81] : memref<112x256xf32, #tpu.memory_space<vmem>>, vector<4x128xf32>
    tpu.vector_store %arg7[%c88_80, %c128_81], %111 {strides = array<i32>} : memref<112x256xf32, #tpu.memory_space<vmem>>, vector<4x128xf32>,
    %113 = vector.extract_strided_slice %66 {offsets = [0, 23], sizes = [4, 128], strides = [1, 1]} : vector<4x152xf32> to vector<4x128xf32>
    %c92_82 = arith.constant 92 : index
    %c128_83 = arith.constant 128 : index
    %114 = vector.load %arg7[%c92_82, %c128_83] : memref<112x256xf32, #tpu.memory_space<vmem>>, vector<4x128xf32>
    tpu.vector_store %arg7[%c92_82, %c128_83], %113 {strides = array<i32>} : memref<112x256xf32, #tpu.memory_space<vmem>>, vector<4x128xf32>,
    %115 = vector.extract_strided_slice %66 {offsets = [0, 24], sizes = [4, 128], strides = [1, 1]} : vector<4x152xf32> to vector<4x128xf32>
    %c96_84 = arith.constant 96 : index
    %c128_85 = arith.constant 128 : index
    %116 = vector.load %arg7[%c96_84, %c128_85] : memref<112x256xf32, #tpu.memory_space<vmem>>, vector<4x128xf32>
    tpu.vector_store %arg7[%c96_84, %c128_85], %115 {strides = array<i32>} : memref<112x256xf32, #tpu.memory_space<vmem>>, vector<4x128xf32>,
    %c0_86 = arith.constant 0 : index
    %c0_87 = arith.constant 0 : index
    %117 = vector.load %arg7[%c0_86, %c0_87] : memref<112x256xf32, #tpu.memory_space<vmem>>, vector<112x256xf32>
    %cst_88 = arith.constant dense<0.000000e+00> : vector<40x256xf32>
    %118 = tpu.matmul %6, %117, %cst_88 {dimension_numbers = #tpu.dot_dimension_numbers<[1], [0], [0], [1], [0, 0, 1, 1], [], []>} : vector<40x112xf32>, vector<112x256xf32>, vector<40x256xf32> -> vector<40x256xf32>
    %cst_89 = arith.constant 0.000000e+00 : f32
    %119 = vector.broadcast %cst_89 : f32 to vector<40x256xf32>
    %120 = arith.cmpf ogt, %118, %119 : vector<40x256xf32>
    %cst_90 = arith.constant 0.000000e+00 : f32
    %121 = vector.broadcast %cst_90 : f32 to vector<40x256xf32>
    %122 = arith.minimumf %118, %121 : vector<40x256xf32>
    %123 = math.exp %122 : vector<40x256xf32>
    %cst_91 = arith.constant 1.000000e+00 : f32
    %124 = vector.broadcast %cst_91 : f32 to vector<40x256xf32>
    %125 = arith.subf %123, %124 : vector<40x256xf32>
    %126 = arith.select %120, %118, %125 : vector<40x256xi1>, vector<40x256xf32>
    %c0_92 = arith.constant 0 : index
    %c0_93 = arith.constant 0 : index
    %127 = vector.load %arg8[%c0_92, %c0_93] : memref<40x256xf32, #tpu.memory_space<vmem>>, vector<40x256xf32>
    tpu.vector_store %arg8[%c0_92, %c0_93], %126 {strides = array<i32>} : memref<40x256xf32, #tpu.memory_space<vmem>>, vector<40x256xf32>,
    %128 = arith.index_cast %10 : i32 to index
    %c0_94 = arith.constant 0 : index
    %129 = vector.load %arg3[%128, %c0_94] : memref<128x2xf32, #tpu.memory_space<vmem>>, vector<128x2xf32>
    %c0_95 = arith.constant 0 : index
    %c0_96 = arith.constant 0 : index
    %130 = vector.load %arg9[%c0_95, %c0_96] : memref<40x128xf32, #tpu.memory_space<vmem>>, vector<40x2xf32>
    %c0_97 = arith.constant 0 : index
    %c0_98 = arith.constant 0 : index
    %131 = vector.load %arg8[%c0_97, %c0_98] : memref<40x256xf32, #tpu.memory_space<vmem>>, vector<40x128xf32>
    %cst_99 = arith.constant dense<0.000000e+00> : vector<40x2xf32>
    %132 = tpu.matmul %131, %129, %cst_99 {dimension_numbers = #tpu.dot_dimension_numbers<[1], [0], [0], [1], [0, 0, 1, 1], [], []>} : vector<40x128xf32>, vector<128x2xf32>, vector<40x2xf32> -> vector<40x2xf32>
    %133 = arith.addf %130, %132 : vector<40x2xf32>
    %c0_100 = arith.constant 0 : index
    %c0_101 = arith.constant 0 : index
    %134 = vector.load %arg9[%c0_100, %c0_101] : memref<40x128xf32, #tpu.memory_space<vmem>>, vector<40x2xf32>
    tpu.vector_store %arg9[%c0_100, %c0_101], %133 {strides = array<i32>} : memref<40x128xf32, #tpu.memory_space<vmem>>, vector<40x2xf32>,
    %c0_102 = arith.constant 0 : index
    %c2 = arith.constant 2 : index
    %135 = vector.load %arg9[%c0_102, %c2] : memref<40x128xf32, #tpu.memory_space<vmem>>, vector<40x2xf32>
    %c0_103 = arith.constant 0 : index
    %c128_104 = arith.constant 128 : index
    %136 = vector.load %arg8[%c0_103, %c128_104] : memref<40x256xf32, #tpu.memory_space<vmem>>, vector<40x128xf32>
    %cst_105 = arith.constant dense<0.000000e+00> : vector<40x2xf32>
    %137 = tpu.matmul %136, %129, %cst_105 {dimension_numbers = #tpu.dot_dimension_numbers<[1], [0], [0], [1], [0, 0, 1, 1], [], []>} : vector<40x128xf32>, vector<128x2xf32>, vector<40x2xf32> -> vector<40x2xf32>
    %138 = arith.addf %135, %137 : vector<40x2xf32>
    %c0_106 = arith.constant 0 : index
    %c2_107 = arith.constant 2 : index
    %139 = vector.load %arg9[%c0_106, %c2_107] : memref<40x128xf32, #tpu.memory_space<vmem>>, vector<40x2xf32>
    tpu.vector_store %arg9[%c0_106, %c2_107], %138 {strides = array<i32>} : memref<40x128xf32, #tpu.memory_space<vmem>>, vector<40x2xf32>,
    %c1_i32_108 = arith.constant 1 : i32
    %c0_109 = arith.constant 0 : index
    %c0_110 = arith.constant 0 : index
    %140 = vector.load %arg4[%c0_109, %c0_110] : memref<40x40xf32, #tpu.memory_space<vmem>>, vector<40x40xf32>
    %c0_111 = arith.constant 0 : index
    %c0_112 = arith.constant 0 : index
    %141 = vector.load %arg9[%c0_111, %c0_112] : memref<40x128xf32, #tpu.memory_space<vmem>>, vector<40x128xf32>
    %cst_113 = arith.constant dense<0.000000e+00> : vector<40x128xf32>
    %142 = tpu.matmul %140, %141, %cst_113 {dimension_numbers = #tpu.dot_dimension_numbers<[1], [0], [0], [1], [0, 0, 1, 1], [], []>} : vector<40x40xf32>, vector<40x128xf32>, vector<40x128xf32> -> vector<40x128xf32>
    %c0_114 = arith.constant 0 : index
    %c0_115 = arith.constant 0 : index
    %143 = vector.load %arg5[%c0_114, %c0_115] : memref<40x1xf32, #tpu.memory_space<vmem>>, vector<40x1xf32>
    %144 = vector.broadcast %143 : vector<40x1xf32> to vector<40x128xf32>
    %145 = arith.addf %142, %144 : vector<40x128xf32>
    %c0_116 = arith.constant 0 : index
    %c0_117 = arith.constant 0 : index
    %c0_118 = arith.constant 0 : index
    %146 = vector.load %arg6[%c0_116, %c0_117, %c0_118] : memref<1x40x128xf32, #tpu.memory_space<vmem>>, vector<1x40x128xf32>
    %147 = vector.shape_cast %146 : vector<1x40x128xf32> to vector<40x128xf32>
    %148 = vector.shape_cast %145 : vector<40x128xf32> to vector<1x40x128xf32>
    tpu.vector_store %arg6[%c0_116, %c0_117, %c0_118], %148 {strides = array<i32>} : memref<1x40x128xf32, #tpu.memory_space<vmem>>, vector<1x40x128xf32>,
    return
  }
  func.func @transform_0(%arg0: i32) -> (i32, i32, i32) {
    %c0_i32 = arith.constant 0 : i32
    %c0_i32_0 = arith.constant 0 : i32
    %c0_i32_1 = arith.constant 0 : i32
    return %arg0, %c0_i32, %c0_i32_0 : i32, i32, i32
  }
  func.func @transform_1(%arg0: i32) -> (i32, i32) {
    %c0_i32 = arith.constant 0 : i32
    %c0_i32_0 = arith.constant 0 : i32
    %c0_i32_1 = arith.constant 0 : i32
    return %c0_i32, %c0_i32_0 : i32, i32
  }
  func.func @transform_2(%arg0: i32) -> (i32, i32) {
    %c0_i32 = arith.constant 0 : i32
    %c0_i32_0 = arith.constant 0 : i32
    %c0_i32_1 = arith.constant 0 : i32
    return %c0_i32, %c0_i32_0 : i32, i32
  }
  func.func @transform_3(%arg0: i32) -> (i32, i32) {
    %c0_i32 = arith.constant 0 : i32
    %c0_i32_0 = arith.constant 0 : i32
    %c0_i32_1 = arith.constant 0 : i32
    return %c0_i32, %c0_i32_0 : i32, i32
  }
  func.func @transform_4(%arg0: i32) -> (i32, i32) {
    %c0_i32 = arith.constant 0 : i32
    %c0_i32_0 = arith.constant 0 : i32
    %c0_i32_1 = arith.constant 0 : i32
    return %c0_i32, %c0_i32_0 : i32, i32
  }
  func.func @transform_5(%arg0: i32) -> (i32, i32, i32) {
    %c0_i32 = arith.constant 0 : i32
    %c0_i32_0 = arith.constant 0 : i32
    %c0_i32_1 = arith.constant 0 : i32
    return %arg0, %c0_i32, %c0_i32_0 : i32, i32, i32
  }
}

</mosaic_0001>

<bundles_post_ra>
// kernel: tpu_custom_call.1
= control target key start
LH: loop header
LB: loop body
LE: loop exit
PB: predicated region body
PF: predicated region fallthrough
CT: control target
= control target key end

     0   :  { %10 = vsyncpa [#allocation6], 0  ;;  %s2225_s0 = inlined_call_operand.vmem [shape: f32[4,4,152], index: 0, kind: input, shape index: {}]   ;;  %s2226_s1 = inlined_call_operand.vmem [shape: f32[40,112], index: 1, kind: input, shape index: {}]   ;;  %s2227_s2 = inlined_call_operand.vmem [shape: f32[128,2], index: 2, kind: input, shape index: {}]   ;;  %s2228_s3 = inlined_call_operand.vmem [shape: f32[40,40], index: 3, kind: input, shape index: {}]   ;;  %s2229_s4 = inlined_call_operand.vmem [shape: f32[40,1], index: 4, kind: input, shape index: {}]   ;;  %s2230_s5 = inlined_call_operand.hbm [shape: f32[2,40,128], index: 5, kind: output, shape index: {}]  }
   0x1   :  { %12 = vsyncpa [#allocation6 + $0x1], 0  ;;  %s1742_s18 = smov 0   ;;  %s1744_s19 = smov 0  }
   0x2   :  { %s1746_s20 = smov 0   ;;  %s1748_s21 = smov 0  }
   0x3 LB: > { %s1763_s22 = sadd.s32 4294967295, %s1678_s21   ;;  %s1316_s23 = sadd.s32 4294967294, %s1678_s21   ;;  %s1678_s21 = sphi %s1748_s21, %s2237_s21   ;;  %s1674_s20 = sphi %s1746_s20, %s2236_s20   ;;  %s1670_s19 = sphi %s1744_s19, %s2235_s19   ;;  %s1666_s18 = sphi %s1742_s18, %s2234_s18  }
   0x4   : > { %s1767_s24 = sadd.s32 1, %s1678_s21   ;;  %s135_s25 = sadd.s32 1, %s1674_s20 }
   0x5   : > { %s132_s26 = ssub.s32 %s1678_s21, %s1767_s24  ;;  %p145_p0 = scmp.ne.s32.totalorder %s1674_s20, %s1670_s19 }
   0x6   : > { %p133_p1 = scmp.eq.s32.totalorder %s132_s26, 0  ;;  %p146_p2 = scmp.eq.s32.totalorder %s1763_s22, 1 }
   0x7   : > { %p151_p3 = scmp.ne.s32.totalorder %s1670_s19, %s1666_s18  ;;  %p152_p4 = scmp.eq.s32.totalorder %s1316_s23, 1 }
   0x8   : > { %s1778_s27 = scalar_select %p133_p1, %s1674_s20, %s135_s25  }
   0x9   : > { %p1780_p5 = por %p146_p2, %p145_p0  ;;  %p1784_p6 = por %p152_p4, %p151_p3 }
   0xa   : > { %p1319_p7 = scmp.ge.s32.totalorder %s1678_s21, 1  ;;  %p192_p8 = scmp.lt.s32.totalorder %s1678_s21, 3 }
   0xc   : > { %p193_p9 = pnand %p1319_p7, %p192_p8 }
   0xd   : > { %s1320_s30 = sshll.u32 (!%p193_p9), %s1763_s22, 1  ;;  %s1682_s11 = smov (!%p193_p9), 104  }
   0xe   : > { %196 = sbr.rel (%p193_p9) target bundleno = 1121 (0x461), region = 40  ;;  %p1791_p10 = scmp.lt.s32.totalorder (!%p193_p9), %s1320_s30, 3 }
   0xf   : > { %s1683_s12 = smov (!%p193_p9), 106   ;;  %s1684_s13 = smov (!%p193_p9), 105  }
  0x10   : > { %s1685_s14 = smov (!%p193_p9), 108   ;;  %s1686_s15 = smov (!%p193_p9), 107  }
  0x11   : > { %s1687_s16 = smov (!%p193_p9), 110   ;;  %s1688_s17 = smov (!%p193_p9), 109  }
  0x12   : > { %s1689_s23 = smov (!%p193_p9), 112   ;;  %s1690_s25 = smov (!%p193_p9), 111  }
  0x13   : > { %v232_v0 = vlaneseq  ;;  %v1680_v1 = vmov 0.0   ;;  %s2239_s30 = smov (!%p1791_p10, %s1320_s30), 3  ;;  %v1681_v2 = vmov 1.0   ;;  %s1691_s26 = smov 114   ;;  %vm442_vm1 = vcmask 850944  }
  0x14   : > { %231 = vst [vmem:[#allocation2 + $0xd8] sm:$0xff] %v1680_v1  ;;  %669 = vmatprep.subr.mxu0 %v1680_v1  ;;  %228 = vst [vmem:[#allocation2 + $0xc0] sm:$0xe0] %v1680_v1  ;;  %729 = vmatprep.mubr.f32.mxu0 %v1680_v1  ;;  %s1347_s7 = sshll.u32 %s2239_s30, 3  ;;  %s1692_s30 = smov 113   ;;  %vm426_vm2 = vcmask 867328  }
  0x15   : > { %229 = vst [vmem:[#allocation2 + $0xc8] sm:$0xe0] %v1680_v1  ;;  %239 = vst [vmem:[#allocation4] sm:$0xff] %v1680_v1  ;;  %670 = vmatpush1.msra.mxu0 %v1680_v1  ;;  %vm234_vm0 = vcmp.lt.s32.totalorder %v232_v0, 256  ;;  %1400 = vmatprep.subr.mxu1 %v1680_v1  ;;  %s226_s10 = scalar_lea.vmem %s2225_s0, %s1347_s7  ;;  %s1693_s6 = smov 116   ;;  %vm434_vm3 = vcmask 859136  }
  0x16   : > { %240 = vst [vmem:[#allocation4 + $0x8] sm:$0xff] %v1680_v1  ;;  %241 = vst [vmem:[#allocation4 + $0x10] sm:$0xff] %v1680_v1  ;;  %v1812_v3 = vld [vmem:[%s226_s10 + $0x8] sm:$0xff]  ;;  %v1814_v4 = vld [vmem:[%s226_s10] sm:$0xff]  ;;  %s1694_s7 = smov 115   ;;  %s1695_s8 = smov 118  }
  0x17   : > { %242 = vst [vmem:[#allocation4 + $0x18] sm:$0xff] %v1680_v1  ;;  %243 = vst [vmem:[#allocation4 + $0x20] sm:$0xff] %v1680_v1  ;;  %615 = vrot.lane.b32.xlu0 %v1812_v3, %s1682_s11  ;;  %438 = vrot.lane.b32.xlu1 %v1814_v4, %s1682_s11  ;;  %v1822_v5 = vcombine.high %v1814_v4, %v1814_v4  ;;  %v1828_v6 = vcombine.high %v1812_v3, %v1812_v3  ;;  %s1696_s9 = smov 117   ;;  %s1697_s10 = smov 120   ;;  %vm410_vm4 = vcmask 883712   ;;  %vm418_vm5 = vcmask 875520  }
  0x18   : > { %237 = vst.msk [vmem:[#allocation2 + $0xc4] ss:$8 sm:$0x3] %vm234_vm0, %v1681_v2  ;;  %450 = vst [vmem:[#allocation2 + $0x8] sm:$0xf] %v1812_v3  ;;  %v1834_v7 = vcombine.low %v1812_v3, %v1812_v3  ;;  %v1842_v8 = vcombine.low %v1814_v4, %v1814_v4  ;;  %vm394_vm6 = vcmask 900096  }
  0x19   : > { %250 = vst [vmem:[#allocation2] sm:$0xf] %v1814_v4  ;;  %vm402_vm7 = vcmask 891904   ;;  %vm378_vm8 = vcmask 916480   ;;  %vm386_vm9 = vcmask 908288   ;;  %vm362_vm10 = vcmask 932864  }
  0x1a   : > { %vm370_vm11 = vcmask 924672   ;;  %vm346_vm12 = vcmask 949248   ;;  %vm354_vm13 = vcmask 941056   ;;  %vm330_vm14 = vcmask 965632  }
  0x1b   : > { %601 = vrot.lane.b32.xlu0 %v1812_v3, %s1683_s12  ;;  %440 = vrot.lane.b32.xlu1 %v1822_v5, %s1682_s11  ;;  %vm338_vm15 = vcmask 957440   ;;  %vm314_vm0 = vcmask 982016  }
  0x1f   : > { %617 = vrot.lane.b32.xlu0 %v1828_v6, %s1682_s11  ;;  %603 = vrot.lane.b32.xlu1 %v1828_v6, %s1683_s12  ;;  %s1698_s11 = smov 119  }
  0x23   : > { %608 = vrot.lane.b32.xlu0 %v1834_v7, %s1684_s13  ;;  %610 = vrot.lane.b32.xlu1 %v1812_v3, %s1684_s13 }
  0x27   : > { %422 = vrot.lane.b32.xlu0 %v1814_v4, %s1683_s12  ;;  %424 = vrot.lane.b32.xlu1 %v1822_v5, %s1683_s12  ;;  %s1699_s12 = smov 122  }
  0x2b   : > { %432 = vrot.lane.b32.xlu1 %v1814_v4, %s1684_s13  ;;  %430 = vrot.lane.b32.xlu0 %v1842_v8, %s1684_s13  ;;  %s1700_s13 = smov 121  }
  0x2f   : > { %589 = vrot.lane.b32.xlu1 %v1828_v6, %s1685_s14  ;;  %587 = vrot.lane.b32.xlu0 %v1812_v3, %s1685_s14 }
  0x33   : > { %596 = vrot.lane.b32.xlu1 %v1812_v3, %s1686_s15  ;;  %594 = vrot.lane.b32.xlu0 %v1834_v7, %s1686_s15 }
  0x37   : > { %408 = vrot.lane.b32.xlu1 %v1822_v5, %s1685_s14  ;;  %406 = vrot.lane.b32.xlu0 %v1814_v4, %s1685_s14  ;;  %s1701_s14 = smov 124  }
  0x3b   : > { %416 = vrot.lane.b32.xlu1 %v1814_v4, %s1686_s15  ;;  %414 = vrot.lane.b32.xlu0 %v1842_v8, %s1686_s15  ;;  %s1702_s15 = smov 123  }
  0x3f   : > { %575 = vrot.lane.b32.xlu1 %v1828_v6, %s1687_s16  ;;  %573 = vrot.lane.b32.xlu0 %v1812_v3, %s1687_s16 }
  0x43   : > { %582 = vrot.lane.b32.xlu1 %v1812_v3, %s1688_s17  ;;  %580 = vrot.lane.b32.xlu0 %v1834_v7, %s1688_s17 }
  0x47   : > { %392 = vrot.lane.b32.xlu1 %v1822_v5, %s1687_s16  ;;  %390 = vrot.lane.b32.xlu0 %v1814_v4, %s1687_s16  ;;  %s1703_s16 = smov 126  }
  0x4b   : > { %400 = vrot.lane.b32.xlu1 %v1814_v4, %s1688_s17  ;;  %398 = vrot.lane.b32.xlu0 %v1842_v8, %s1688_s17  ;;  %s1704_s17 = smov 125  }
  0x4f   : > { %561 = vrot.lane.b32.xlu1 %v1828_v6, %s1689_s23  ;;  %559 = vrot.lane.b32.xlu0 %v1812_v3, %s1689_s23 }
  0x53   : > { %568 = vrot.lane.b32.xlu1 %v1812_v3, %s1690_s25  ;;  %566 = vrot.lane.b32.xlu0 %v1834_v7, %s1690_s25 }
  0x57   : > { %376 = vrot.lane.b32.xlu1 %v1822_v5, %s1689_s23  ;;  %374 = vrot.lane.b32.xlu0 %v1814_v4, %s1689_s23  ;;  %s1705_s23 = smov 127  }
  0x5b   : > { %384 = vrot.lane.b32.xlu1 %v1814_v4, %s1690_s25  ;;  %382 = vrot.lane.b32.xlu0 %v1842_v8, %s1690_s25 }
  0x5f   : > { %547 = vrot.lane.b32.xlu1 %v1828_v6, %s1691_s26  ;;  %545 = vrot.lane.b32.xlu0 %v1812_v3, %s1691_s26 }
  0x63   : > { %554 = vrot.lane.b32.xlu1 %v1812_v3, %s1692_s30  ;;  %552 = vrot.lane.b32.xlu0 %v1834_v7, %s1692_s30 }
  0x67   : > { %360 = vrot.lane.b32.xlu1 %v1822_v5, %s1691_s26  ;;  %358 = vrot.lane.b32.xlu0 %v1814_v4, %s1691_s26 }
  0x6b   : > { %368 = vrot.lane.b32.xlu1 %v1814_v4, %s1692_s30  ;;  %366 = vrot.lane.b32.xlu0 %v1842_v8, %s1692_s30 }
  0x6f   : > { %533 = vrot.lane.b32.xlu1 %v1828_v6, %s1693_s6  ;;  %531 = vrot.lane.b32.xlu0 %v1812_v3, %s1693_s6 }
  0x73   : > { %540 = vrot.lane.b32.xlu1 %v1812_v3, %s1694_s7  ;;  %538 = vrot.lane.b32.xlu0 %v1834_v7, %s1694_s7 }
  0x77   : > { %344 = vrot.lane.b32.xlu1 %v1822_v5, %s1693_s6  ;;  %342 = vrot.lane.b32.xlu0 %v1814_v4, %s1693_s6  ;;  %s1520_s6 = smul.u32 640, %s1763_s22 }
  0x7b   : > { %352 = vrot.lane.b32.xlu1 %v1814_v4, %s1694_s7  ;;  %350 = vrot.lane.b32.xlu0 %v1842_v8, %s1694_s7 }
  0x7f   : > { %519 = vrot.lane.b32.xlu1 %v1828_v6, %s1695_s8  ;;  %517 = vrot.lane.b32.xlu0 %v1812_v3, %s1695_s8 }
  0x83   : > { %526 = vrot.lane.b32.xlu1 %v1812_v3, %s1696_s9  ;;  %524 = vrot.lane.b32.xlu0 %v1834_v7, %s1696_s9 }
  0x87   : > { %328 = vrot.lane.b32.xlu1 %v1822_v5, %s1695_s8  ;;  %326 = vrot.lane.b32.xlu0 %v1814_v4, %s1695_s8 }
  0x89   : > { %v616_v9 = vpop.permute.xlu0 %615  ;;  %v439_v10 = vpop.permute.xlu1 %438 }
  0x8b   : > { %336 = vrot.lane.b32.xlu1 %v1814_v4, %s1696_s9  ;;  %334 = vrot.lane.b32.xlu0 %v1842_v8, %s1696_s9  ;;  %s2181_s9 = scalar_lea.hbm %s2230_s5, %s1520_s6 }
  0x8d   : > { %v602_v11 = vpop.permute.xlu0 %601  ;;  %v441_v12 = vpop.permute.xlu1 %440 }
  0x8e   : > { %v443_v13 = vsel %vm442_vm1, %v439_v10, %v441_v12 }
  0x8f   : > { %445 = vst [vmem:[#allocation2 + $0xc0] sm:$0xf] %v443_v13  ;;  %505 = vrot.lane.b32.xlu1 %v1828_v6, %s1697_s10  ;;  %503 = vrot.lane.b32.xlu0 %v1812_v3, %s1697_s10 }
  0x91   : > { %v618_v14 = vpop.permute.xlu0 %617  ;;  %v604_v15 = vpop.permute.xlu1 %603 }
  0x92   : > { %v619_v16 = vsel %vm442_vm1, %v616_v9, %v618_v14  ;;  %v605_v17 = vsel %vm426_vm2, %v602_v11, %v604_v15  ;;  %vm322_vm1 = vcmask 973824  }
  0x93   : > { %621 = vst [vmem:[#allocation2 + $0xc8] sm:$0xf] %v619_v16  ;;  %607 = vst [vmem:[#allocation2 + $0xb8] sm:$0xf] %v605_v17  ;;  %512 = vrot.lane.b32.xlu1 %v1812_v3, %s1698_s11  ;;  %510 = vrot.lane.b32.xlu0 %v1834_v7, %s1698_s11 }
  0x95   : > { %v609_v18 = vpop.permute.xlu0 %608  ;;  %v611_v19 = vpop.permute.xlu1 %610 }
  0x96   : > { %v612_v20 = vsel %vm434_vm3, %v609_v18, %v611_v19  ;;  %v646_v25 = vld [vmem:[#allocation2 + $0xc0] sm:$0xff] }
  0x97   : > { %614 = vst [vmem:[#allocation2 + $0xb8] sm:$0xf0] %v612_v20  ;;  %312 = vrot.lane.b32.xlu1 %v1822_v5, %s1697_s10  ;;  %310 = vrot.lane.b32.xlu0 %v1814_v4, %s1697_s10 }
  0x99   : > { %v423_v21 = vpop.permute.xlu0 %422  ;;  %v425_v22 = vpop.permute.xlu1 %424 }
  0x9a   : > { %v427_v23 = vsel %vm426_vm2, %v423_v21, %v425_v22  ;;  %v647_v24 = vld [vmem:[#allocation2 + $0xc8] sm:$0xff]  ;;  %vm298_vm2 = vcmask 998400  }
  0x9b   : > { %429 = vst [vmem:[#allocation2 + $0xb0] sm:$0xf] %v427_v23  ;;  %671 = vmatprep.subr.mxu0 %v647_v24  ;;  %320 = vrot.lane.b32.xlu1 %v1814_v4, %s1698_s11 }
  0x9c   : > { %318 = vrot.lane.b32.xlu0 %v1842_v8, %s1698_s11  ;;  %672 = vmatpush1.msra.mxu0 %v646_v25  ;;  %v1951_v25 = vld [vmem:[%s2227_s2 + $0x78] sm:$0xff]  ;;  %s1709_s11 = smov [#allocation5]  }
  0x9d   : > { %v433_v26 = vpop.permute.xlu1 %432  ;;  %v431_v27 = vpop.permute.xlu0 %430  ;;  %1401 = vmatpush3.msra.mxu1 %v1951_v25 }
  0x9e   : > { %v435_v28 = vsel %vm434_vm3, %v431_v27, %v433_v26  ;;  %v645_v29 = vld [vmem:[#allocation2 + $0xb8] sm:$0xff]  ;;  %v1956_v26 = vld [vmem:[%s2227_s2 + $0x70] sm:$0xff]  ;;  %1402 = vmatprep.subr.mxu1 %v1680_v1  ;;  %vm306_vm3 = vcmask 990208  }
  0x9f   : > { %437 = vst [vmem:[#allocation2 + $0xb0] sm:$0xf0] %v435_v28  ;;  %491 = vrot.lane.b32.xlu1 %v1828_v6, %s1699_s12  ;;  %673 = vmatprep.subr.mxu0 %v645_v29  ;;  %v1964_v28 = vld [vmem:[%s2227_s2 + $0x68] sm:$0xff] }
  0xa0   : > { %489 = vrot.lane.b32.xlu0 %v1812_v3, %s1699_s12  ;;  %1403 = vmatpush3.msra.mxu1 %v1956_v26 }
  0xa1   : > { %v590_v30 = vpop.permute.xlu1 %589  ;;  %v588_v31 = vpop.permute.xlu0 %587  ;;  %1404 = vmatprep.subr.mxu1 %v1680_v1 }
  0xa2   : > { %v591_v32 = vsel %vm410_vm4, %v588_v31, %v590_v30  ;;  %v1971_v31 = vld [vmem:[%s2227_s2 + $0x60] sm:$0xff]  ;;  %1405 = vmatpush3.msra.mxu1 %v1964_v28 }
  0xa3   : > { %593 = vst [vmem:[#allocation2 + $0xa8] sm:$0xf] %v591_v32  ;;  %498 = vrot.lane.b32.xlu1 %v1812_v3, %s1700_s13  ;;  %1406 = vmatprep.subr.mxu1 %v1680_v1 }
  0xa4   : > { %496 = vrot.lane.b32.xlu0 %v1834_v7, %s1700_s13  ;;  %1407 = vmatpush3.msra.mxu1 %v1971_v31 }
  0xa5   : > { %v597_v33 = vpop.permute.xlu1 %596  ;;  %v595_v34 = vpop.permute.xlu0 %594  ;;  %1408 = vmatprep.subr.mxu1 %v1680_v1 }
  0xa6   : > { %v598_v35 = vsel %vm418_vm5, %v595_v34, %v597_v33  ;;  %v644_v36 = vld [vmem:[#allocation2 + $0xb0] sm:$0xff]  ;;  %v1979_v34 = vld [vmem:[%s2227_s2 + $0x58] sm:$0xff] }
  0xa7   : > { %600 = vst [vmem:[#allocation2 + $0xa8] sm:$0xf0] %v598_v35  ;;  %296 = vrot.lane.b32.xlu1 %v1822_v5, %s1699_s12  ;;  %674 = vmatpush1.msra.mxu0 %v644_v36 }
  0xa8   : > { %294 = vrot.lane.b32.xlu0 %v1814_v4, %s1699_s12  ;;  %1409 = vmatpush3.msra.mxu1 %v1979_v34  ;;  %s1622_s12 = sshll.u32 %s1709_s11, 4  ;;  %s1623_s12 = int_to_ptr.vmem [resolvable:$false] %s1622_s12 }
  0xa9   : > { %v409_v37 = vpop.permute.xlu1 %408  ;;  %v407_v38 = vpop.permute.xlu0 %406  ;;  %1410 = vmatprep.subr.mxu1 %v1680_v1 }
  0xaa   : > { %v411_v39 = vsel %vm410_vm4, %v407_v38, %v409_v37  ;;  %vm282_vm4 = vcmask 1014784  }
  0xab   : > { %413 = vst [vmem:[#allocation2 + $0xa0] sm:$0xf] %v411_v39  ;;  %304 = vrot.lane.b32.xlu1 %v1814_v4, %s1700_s13 }
  0xac   : > { %302 = vrot.lane.b32.xlu0 %v1842_v8, %s1700_s13  ;;  %s1707_s13 = smov 2  }
  0xad   : > { %v417_v40 = vpop.permute.xlu1 %416  ;;  %v415_v41 = vpop.permute.xlu0 %414 }
  0xae   : > { %v419_v42 = vsel %vm418_vm5, %v415_v41, %v417_v40  ;;  %v643_v43 = vld [vmem:[#allocation2 + $0xa8] sm:$0xff]  ;;  %vm290_vm5 = vcmask 1006592  }
  0xaf   : > { %421 = vst [vmem:[#allocation2 + $0xa0] sm:$0xf0] %v419_v42  ;;  %477 = vrot.lane.b32.xlu1 %v1828_v6, %s1701_s14  ;;  %675 = vmatprep.subr.mxu0 %v643_v43 }
  0xb0   : > { %475 = vrot.lane.b32.xlu0 %v1812_v3, %s1701_s14 }
  0xb1   : > { %v576_v44 = vpop.permute.xlu1 %575  ;;  %v574_v45 = vpop.permute.xlu0 %573 }
  0xb2   : > { %v577_v46 = vsel %vm394_vm6, %v574_v45, %v576_v44 }
  0xb3   : > { %579 = vst [vmem:[#allocation2 + $0x98] sm:$0xf] %v577_v46  ;;  %484 = vrot.lane.b32.xlu1 %v1812_v3, %s1702_s15 }
  0xb4   : > { %482 = vrot.lane.b32.xlu0 %v1834_v7, %s1702_s15 }
  0xb5   : > { %v583_v47 = vpop.permute.xlu1 %582  ;;  %v581_v48 = vpop.permute.xlu0 %580 }
  0xb6   : > { %v584_v49 = vsel %vm402_vm7, %v581_v48, %v583_v47  ;;  %v642_v50 = vld [vmem:[#allocation2 + $0xa0] sm:$0xff] }
  0xb7   : > { %586 = vst [vmem:[#allocation2 + $0x98] sm:$0xf0] %v584_v49  ;;  %280 = vrot.lane.b32.xlu1 %v1822_v5, %s1701_s14  ;;  %676 = vmatpush1.msra.mxu0 %v642_v50 }
  0xb8   : > { %278 = vrot.lane.b32.xlu0 %v1814_v4, %s1701_s14 }
  0xb9   : > { %v393_v51 = vpop.permute.xlu1 %392  ;;  %v391_v52 = vpop.permute.xlu0 %390 }
  0xba   : > { %v395_v53 = vsel %vm394_vm6, %v391_v52, %v393_v51  ;;  %vm266_vm6 = vcmask 1031168  }
  0xbb   : > { %397 = vst [vmem:[#allocation2 + $0x90] sm:$0xf] %v395_v53  ;;  %288 = vrot.lane.b32.xlu1 %v1814_v4, %s1702_s15 }
  0xbc   : > { %286 = vrot.lane.b32.xlu0 %v1842_v8, %s1702_s15 }
  0xbd   : > { %v401_v54 = vpop.permute.xlu1 %400  ;;  %v399_v55 = vpop.permute.xlu0 %398 }
  0xbe   : > { %v403_v56 = vsel %vm402_vm7, %v399_v55, %v401_v54  ;;  %v641_v57 = vld [vmem:[#allocation2 + $0x98] sm:$0xff]  ;;  %vm274_vm7 = vcmask 1022976  }
  0xbf   : > { %405 = vst [vmem:[#allocation2 + $0x90] sm:$0xf0] %v403_v56  ;;  %463 = vrot.lane.b32.xlu1 %v1828_v6, %s1703_s16  ;;  %677 = vmatprep.subr.mxu0 %v641_v57 }
  0xc0   : > { %461 = vrot.lane.b32.xlu0 %v1812_v3, %s1703_s16 }
  0xc1   : > { %v562_v58 = vpop.permute.xlu1 %561  ;;  %v560_v59 = vpop.permute.xlu0 %559 }
  0xc2   : > { %v563_v60 = vsel %vm378_vm8, %v560_v59, %v562_v58 }
  0xc3   : > { %565 = vst [vmem:[#allocation2 + $0x88] sm:$0xf] %v563_v60  ;;  %470 = vrot.lane.b32.xlu1 %v1812_v3, %s1704_s17 }
  0xc4   : > { %468 = vrot.lane.b32.xlu0 %v1834_v7, %s1704_s17 }
  0xc5   : > { %v569_v61 = vpop.permute.xlu1 %568  ;;  %v567_v62 = vpop.permute.xlu0 %566 }
  0xc6   : > { %v570_v63 = vsel %vm386_vm9, %v567_v62, %v569_v61  ;;  %v640_v0 = vld [vmem:[#allocation2 + $0x90] sm:$0xff] }
  0xc7   : > { %572 = vst [vmem:[#allocation2 + $0x88] sm:$0xf0] %v570_v63  ;;  %264 = vrot.lane.b32.xlu1 %v1822_v5, %s1703_s16  ;;  %678 = vmatpush1.msra.mxu0 %v640_v0 }
  0xc8   : > { %262 = vrot.lane.b32.xlu0 %v1814_v4, %s1703_s16 }
  0xc9   : > { %v377_v2 = vpop.permute.xlu1 %376  ;;  %v375_v6 = vpop.permute.xlu0 %374 }
  0xca   : > { %v379_v9 = vsel %vm378_vm8, %v375_v6, %v377_v2 }
  0xcb   : > { %381 = vst [vmem:[#allocation2 + $0x80] sm:$0xf] %v379_v9  ;;  %272 = vrot.lane.b32.xlu1 %v1814_v4, %s1704_s17 }
  0xcc   : > { %270 = vrot.lane.b32.xlu0 %v1842_v8, %s1704_s17 }
  0xcd   : > { %v385_v10 = vpop.permute.xlu1 %384  ;;  %v383_v11 = vpop.permute.xlu0 %382 }
  0xce   : > { %v387_v12 = vsel %vm386_vm9, %v383_v11, %v385_v10  ;;  %v639_v13 = vld [vmem:[#allocation2 + $0x88] sm:$0xff]  ;;  %vm257_vm9 = vcmask 1039360  }
  0xcf   : > { %389 = vst [vmem:[#allocation2 + $0x80] sm:$0xf0] %v387_v12  ;;  %455 = vrot.lane.b32.xlu1 %v1812_v3, %s1705_s23  ;;  %679 = vmatprep.subr.mxu0 %v639_v13 }
  0xd0   : > { %453 = vrot.lane.b32.xlu0 %v1834_v7, %s1705_s23 }
  0xd1   : > { %v548_v5 = vpop.permute.xlu1 %547  ;;  %v546_v14 = vpop.permute.xlu0 %545 }
  0xd2   : > { %v549_v15 = vsel %vm362_vm10, %v546_v14, %v548_v5 }
  0xd3   : > { %551 = vst [vmem:[#allocation2 + $0x78] sm:$0xf] %v549_v15  ;;  %255 = vrot.lane.b32.xlu1 %v1814_v4, %s1705_s23 }
  0xd4   : > { %253 = vrot.lane.b32.xlu0 %v1842_v8, %s1705_s23  ;;  %s218_s23 = sand.u32 1, %s1670_s19  }
  0xd5   : > { %v555_v16 = vpop.permute.xlu1 %554  ;;  %v553_v17 = vpop.permute.xlu0 %552  ;;  %s1519_s25 = smul.u32 40, %s218_s23  ;;  %s2185_s10 = scalar_lea.sflag [#allocation6], %s218_s23 }
  0xd6   : > { %v556_v18 = vsel %vm370_vm11, %v553_v17, %v555_v16  ;;  %v638_v19 = vld [vmem:[#allocation2 + $0x80] sm:$0xff] }
  0xd7   : > { %558 = vst [vmem:[#allocation2 + $0x78] sm:$0xf0] %v556_v18  ;;  %680 = vmatpush1.msra.mxu0 %v638_v19  ;;  %s220_s26 = scalar_lea.vmem [#allocation5], %s1519_s25 }
  0xd8   : > { %s1253_s30 = sshll.u32 %s220_s26, 4  ;;  %s2176_s30 = int_to_ptr.vmem [resolvable:$true] %s1253_s30 }
  0xd9   : > { %v361_v3 = vpop.permute.xlu1 %360  ;;  %v359_v20 = vpop.permute.xlu0 %358  ;;  %s1618_s22 = scalar_lea.vmem %s2176_s30, 640  ;;  %p1625_p0 = scmp.lt.s32.totalorder %s2176_s30, %s1623_s12 }
  0xda   : > { %v363_v7 = vsel %vm362_vm10, %v359_v20, %v361_v3  ;;  %p1619_p11 = scmp.ne.s32.totalorder %s2176_s30, %s1618_s22 }
  0xdb   : > { %365 = vst [vmem:[#allocation2 + $0x70] sm:$0xf] %v363_v7 }
  0xdc   : > { %p1620_p12 = pnand %p1619_p11, %p1780_p5 }
  0xdd   : > { %v369_v21 = vpop.permute.xlu1 %368  ;;  %v367_v22 = vpop.permute.xlu0 %366 }
  0xde   : > { %v371_v23 = vsel %vm370_vm11, %v367_v22, %v369_v21  ;;  %v637_v24 = vld [vmem:[#allocation2 + $0x78] sm:$0xff]  ;;  %p1621_p13 = pneg %p1620_p12 }
  0xdf   : > { %373 = vst [vmem:[#allocation2 + $0x70] sm:$0xf0] %v371_v23  ;;  %681 = vmatprep.subr.mxu0 %v637_v24 }
  0xe1   : > { %v534_v4 = vpop.permute.xlu1 %533  ;;  %v532_v8 = vpop.permute.xlu0 %531 }
  0xe2   : > { %v535_v27 = vsel %vm346_vm12, %v532_v8, %v534_v4 }
  0xe3   : > { %537 = vst [vmem:[#allocation2 + $0x68] sm:$0xf] %v535_v27 }
  0xe5   : > { %v541_v29 = vpop.permute.xlu1 %540  ;;  %v539_v30 = vpop.permute.xlu0 %538 }
  0xe6   : > { %v542_v32 = vsel %vm354_vm13, %v539_v30, %v541_v29  ;;  %v636_v33 = vld [vmem:[#allocation2 + $0x70] sm:$0xff] }
  0xe7   : > { %544 = vst [vmem:[#allocation2 + $0x68] sm:$0xf0] %v542_v32  ;;  %682 = vmatpush1.msra.mxu0 %v636_v33 }
  0xe9   : > { %v345_v35 = vpop.permute.xlu1 %344  ;;  %v343_v36 = vpop.permute.xlu0 %342 }
  0xea   : > { %v347_v37 = vsel %vm346_vm12, %v343_v36, %v345_v35 }
  0xeb   : > { %349 = vst [vmem:[#allocation2 + $0x60] sm:$0xf] %v347_v37 }
  0xed   : > { %v353_v38 = vpop.permute.xlu1 %352  ;;  %v351_v39 = vpop.permute.xlu0 %350 }
  0xee   : > { %v355_v40 = vsel %vm354_vm13, %v351_v39, %v353_v38  ;;  %v635_v41 = vld [vmem:[#allocation2 + $0x68] sm:$0xff] }
  0xef   : > { %357 = vst [vmem:[#allocation2 + $0x60] sm:$0xf0] %v355_v40  ;;  %683 = vmatprep.subr.mxu0 %v635_v41 }
  0xf1   : > { %v520_v42 = vpop.permute.xlu1 %519  ;;  %v518_v43 = vpop.permute.xlu0 %517 }
  0xf2   : > { %v521_v44 = vsel %vm330_vm14, %v518_v43, %v520_v42 }
  0xf3   : > { %523 = vst [vmem:[#allocation2 + $0x58] sm:$0xf] %v521_v44 }
  0xf5   : > { %v527_v45 = vpop.permute.xlu1 %526  ;;  %v525_v46 = vpop.permute.xlu0 %524 }
  0xf6   : > { %v528_v47 = vsel %vm338_vm15, %v525_v46, %v527_v45  ;;  %v634_v48 = vld [vmem:[#allocation2 + $0x60] sm:$0xff] }
  0xf7   : > { %530 = vst [vmem:[#allocation2 + $0x58] sm:$0xf0] %v528_v47  ;;  %684 = vmatpush1.msra.mxu0 %v634_v48 }
  0xf9   : > { %v329_v49 = vpop.permute.xlu1 %328  ;;  %v327_v50 = vpop.permute.xlu0 %326 }
  0xfa   : > { %v331_v51 = vsel %vm330_vm14, %v327_v50, %v329_v49 }
  0xfb   : > { %333 = vst [vmem:[#allocation2 + $0x50] sm:$0xf] %v331_v51 }
  0xfd   : > { %v337_v52 = vpop.permute.xlu1 %336  ;;  %v335_v53 = vpop.permute.xlu0 %334 }
  0xfe   : > { %v339_v54 = vsel %vm338_vm15, %v335_v53, %v337_v52  ;;  %v633_v55 = vld [vmem:[#allocation2 + $0x58] sm:$0xff] }
  0xff   : > { %341 = vst [vmem:[#allocation2 + $0x50] sm:$0xf0] %v339_v54  ;;  %685 = vmatprep.subr.mxu0 %v633_v55 }
 0x101   : > { %v506_v56 = vpop.permute.xlu1 %505  ;;  %v504_v57 = vpop.permute.xlu0 %503 }
 0x102   : > { %v507_v58 = vsel %vm314_vm0, %v504_v57, %v506_v56 }
 0x103   : > { %509 = vst [vmem:[#allocation2 + $0x48] sm:$0xf] %v507_v58 }
 0x105   : > { %v513_v59 = vpop.permute.xlu1 %512  ;;  %v511_v60 = vpop.permute.xlu0 %510 }
 0x106   : > { %v514_v61 = vsel %vm322_vm1, %v511_v60, %v513_v59  ;;  %v632_v62 = vld [vmem:[#allocation2 + $0x50] sm:$0xff] }
 0x107   : > { %516 = vst [vmem:[#allocation2 + $0x48] sm:$0xf0] %v514_v61  ;;  %686 = vmatpush1.msra.mxu0 %v632_v62  ;;  %v244_v62 = vld [vmem:[%s2226_s1] sm:$0xff] }
 0x109   : > { %v313_v63 = vpop.permute.xlu1 %312  ;;  %v311_v0 = vpop.permute.xlu0 %310 }
 0x10a   : > { %v315_v2 = vsel %vm314_vm0, %v311_v0, %v313_v63  ;;  %v245_v0 = vld [vmem:[%s2226_s1 + $0x8] sm:$0xff] }
 0x10b   : > { %317 = vst [vmem:[#allocation2 + $0x40] sm:$0xf] %v315_v2  ;;  %v246_v2 = vld [vmem:[%s2226_s1 + $0x10] sm:$0xff] }
 0x10d   : > { %v321_v6 = vpop.permute.xlu1 %320 }
 0x10e   : > { %v319_v9 = vpop.permute.xlu0 %318  ;;  %v631_v10 = vld [vmem:[#allocation2 + $0x48] sm:$0xff] }
 0x10f   : > { %v323_v11 = vsel %vm322_vm1, %v319_v9, %v321_v6  ;;  %687 = vmatprep.subr.mxu0 %v631_v10  ;;  %v837_v6 = vld [vmem:[%s2227_s2 + $0x38] sm:$0xff]  ;;  %v836_v9 = vld [vmem:[%s2227_s2 + $0x30] sm:$0xff]  ;;  %v835_v10 = vld [vmem:[%s2227_s2 + $0x28] sm:$0xff] }
 0x110   : > { %325 = vst [vmem:[#allocation2 + $0x40] sm:$0xf0] %v323_v11  ;;  %v834_v11 = vld [vmem:[%s2227_s2 + $0x20] sm:$0xff] }
 0x111   : > { %v492_v12 = vpop.permute.xlu1 %491 }
 0x112   : > { %v490_v13 = vpop.permute.xlu0 %489 }
 0x113   : > { %v493_v5 = vsel %vm298_vm2, %v490_v13, %v492_v12  ;;  %v833_v12 = vld [vmem:[%s2227_s2 + $0x18] sm:$0xff]  ;;  %v832_v13 = vld [vmem:[%s2227_s2 + $0x10] sm:$0xff] }
 0x114   : > { %495 = vst [vmem:[#allocation2 + $0x38] sm:$0xf] %v493_v5  ;;  %v831_v5 = vld [vmem:[%s2227_s2 + $0x8] sm:$0xff] }
 0x115   : > { %v499_v14 = vpop.permute.xlu1 %498 }
 0x116   : > { %v497_v15 = vpop.permute.xlu0 %496 }
 0x117   : > { %v500_v16 = vsel %vm306_vm3, %v497_v15, %v499_v14  ;;  %v630_v17 = vld [vmem:[#allocation2 + $0x40] sm:$0xff] }
 0x118   : > { %502 = vst [vmem:[#allocation2 + $0x38] sm:$0xf0] %v500_v16  ;;  %688 = vmatpush1.msra.mxu0 %v630_v17  ;;  %v830_v14 = vld [vmem:[%s2227_s2] sm:$0xff] }
 0x119   : > { %v297_v18 = vpop.permute.xlu1 %296 }
 0x11a   : > { %v295_v19 = vpop.permute.xlu0 %294 }
 0x11b   : > { %v299_v3 = vsel %vm298_vm2, %v295_v19, %v297_v18 }
 0x11c   : > { %301 = vst [vmem:[#allocation2 + $0x30] sm:$0xf] %v299_v3 }
 0x11d   : > { %v305_v20 = vpop.permute.xlu1 %304 }
 0x11e   : > { %v303_v7 = vpop.permute.xlu0 %302 }
 0x11f   : > { %v307_v21 = vsel %vm306_vm3, %v303_v7, %v305_v20  ;;  %v629_v22 = vld [vmem:[#allocation2 + $0x38] sm:$0xff] }
 0x120   : > { %309 = vst [vmem:[#allocation2 + $0x30] sm:$0xf0] %v307_v21  ;;  %689 = vmatprep.subr.mxu0 %v629_v22 }
 0x121   : > { %v478_v23 = vpop.permute.xlu1 %477 }
 0x122   : > { %v476_v24 = vpop.permute.xlu0 %475 }
 0x123   : > { %v479_v4 = vsel %vm282_vm4, %v476_v24, %v478_v23 }
 0x124   : > { %481 = vst [vmem:[#allocation2 + $0x28] sm:$0xf] %v479_v4 }
 0x125   : > { %v485_v8 = vpop.permute.xlu1 %484 }
 0x126   : > { %v483_v27 = vpop.permute.xlu0 %482 }
 0x127   : > { %v486_v29 = vsel %vm290_vm5, %v483_v27, %v485_v8  ;;  %v628_v30 = vld [vmem:[#allocation2 + $0x30] sm:$0xff] }
 0x128   : > { %488 = vst [vmem:[#allocation2 + $0x28] sm:$0xf0] %v486_v29  ;;  %690 = vmatpush1.msra.mxu0 %v628_v30 }
 0x129   : > { %v281_v32 = vpop.permute.xlu1 %280 }
 0x12a   : > { %v279_v33 = vpop.permute.xlu0 %278 }
 0x12b   : > { %v283_v35 = vsel %vm282_vm4, %v279_v33, %v281_v32  ;;  %vm951_vm4 = vcmask 15360  }
 0x12c   : > { %285 = vst [vmem:[#allocation2 + $0x20] sm:$0xf] %v283_v35 }
 0x12d   : > { %v289_v36 = vpop.permute.xlu1 %288 }
 0x12e   : > { %v287_v37 = vpop.permute.xlu0 %286 }
 0x12f   : > { %v291_v38 = vsel %vm290_vm5, %v287_v37, %v289_v36  ;;  %v627_v39 = vld [vmem:[#allocation2 + $0x28] sm:$0xff]  ;;  %vm1082_vm5 = vcmask 31760  }
 0x130   : > { %293 = vst [vmem:[#allocation2 + $0x20] sm:$0xf0] %v291_v38  ;;  %691 = vmatprep.subr.mxu0 %v627_v39 }
 0x131   : > { %v464_v40 = vpop.permute.xlu1 %463 }
 0x132   : > { %v462_v41 = vpop.permute.xlu0 %461 }
 0x133   : > { %v465_v42 = vsel %vm266_vm6, %v462_v41, %v464_v40 }
 0x134   : > { %467 = vst [vmem:[#allocation2 + $0x18] sm:$0xf] %v465_v42 }
 0x135   : > { %v471_v43 = vpop.permute.xlu1 %470 }
 0x136   : > { %v469_v44 = vpop.permute.xlu0 %468 }
 0x137   : > { %v472_v45 = vsel %vm274_vm7, %v469_v44, %v471_v43  ;;  %v626_v46 = vld [vmem:[#allocation2 + $0x20] sm:$0xff] }
 0x138   : > { %474 = vst [vmem:[#allocation2 + $0x18] sm:$0xf0] %v472_v45  ;;  %692 = vmatpush1.msra.mxu0 %v626_v46 }
 0x139   : > { %v265_v47 = vpop.permute.xlu1 %264 }
 0x13a   : > { %v263_v48 = vpop.permute.xlu0 %262 }
 0x13b   : > { %v267_v49 = vsel %vm266_vm6, %v263_v48, %v265_v47  ;;  %vm1128_vm6 = vcmask 326656  }
 0x13c   : > { %269 = vst [vmem:[#allocation2 + $0x10] sm:$0xf] %v267_v49 }
 0x13d   : > { %v273_v50 = vpop.permute.xlu1 %272 }
 0x13e   : > { %v271_v51 = vpop.permute.xlu0 %270 }
 0x13f   : > { %v275_v52 = vsel %vm274_vm7, %v271_v51, %v273_v50  ;;  %v625_v53 = vld [vmem:[#allocation2 + $0x18] sm:$0xff] }
 0x140   : > { %277 = vst [vmem:[#allocation2 + $0x10] sm:$0xf0] %v275_v52  ;;  %693 = vmatprep.subr.mxu0 %v625_v53 }
 0x141   : > { %v456_v54 = vpop.permute.xlu1 %455 }
 0x142   : > { %v454_v55 = vpop.permute.xlu0 %453 }
 0x143   : > { %v457_v56 = vsel %vm257_vm9, %v454_v55, %v456_v54  ;;  %v2086_v54 = vld [vmem:[#allocation2 + $0xd8] sm:$0xff] }
 0x144   : > { %459 = vst [vmem:[#allocation2 + $0x8] sm:$0xf0] %v457_v56 }
 0x145   : > { %v256_v57 = vpop.permute.xlu1 %255 }
 0x146   : > { %v254_v58 = vpop.permute.xlu0 %253 }
 0x147   : > { %v258_v59 = vsel %vm257_vm9, %v254_v58, %v256_v57  ;;  %v624_v60 = vld [vmem:[#allocation2 + $0x10] sm:$0xff] }
 0x148   : > { %260 = vst [vmem:[#allocation2] sm:$0xf0] %v258_v59  ;;  %694 = vmatpush1.msra.mxu0 %v624_v60 }
 0x14b   : > { %v623_v61 = vld [vmem:[#allocation2 + $0x8] sm:$0xff] }
 0x14c   : > { %695 = vmatprep.subr.mxu0 %v623_v61 }
 0x14f   : > { %v622_v63 = vld [vmem:[#allocation2] sm:$0xff] }
 0x150   : > { %696 = vmatpush1.msra.mxu0 %v622_v63 }
 0x151   : > { %1324 = vmatmul.mubr.msk.f32.vlgmr.msra.gmra.mxu0 %vm378_vm8, %v244_v62  ;;  %1447 = vmatprep.subr.mxu0 %v1680_v1 }
 0x152   : > { %735 = vmatprep.mubr.f32.mxu0 %v1680_v1  ;;  %1448 = vmatpush3.msra.mxu0 %v1951_v25  ;;  %v247_v25 = vld [vmem:[%s2226_s1 + $0x18] sm:$0xff] }
 0x153   : > { %1449 = vmatprep.subr.mxu0 %v1680_v1 }
 0x154   : > { %1450 = vmatpush3.msra.mxu0 %v1956_v26  ;;  %v248_v26 = vld [vmem:[%s2226_s1 + $0x20] sm:$0xff] }
 0x155   : > { %1325 = vmatmul.mubr.msk.f32.gmra.mxu0 %vm378_vm8, %v245_v0  ;;  %1451 = vmatprep.subr.mxu0 %v1680_v1 }
 0x156   : > { %741 = vmatprep.mubr.f32.mxu0 %v1680_v1  ;;  %1452 = vmatpush3.msra.mxu0 %v1964_v28  ;;  %v840_v28 = vld [vmem:[%s2227_s2 + $0x50] sm:$0xff] }
 0x157   : > { %1453 = vmatprep.subr.mxu0 %v1680_v1  ;;  %1411 = vmatpush3.msra.mxu1 %v840_v28 }
 0x158   : > { %1454 = vmatpush3.msra.mxu0 %v1971_v31  ;;  %1412 = vmatprep.subr.mxu1 %v1680_v1  ;;  %v839_v31 = vld [vmem:[%s2227_s2 + $0x48] sm:$0xff] }
 0x159   : > { %1326 = vmatmul.mubr.msk.f32.gmra.mxu0 %vm378_vm8, %v246_v2  ;;  %1455 = vmatprep.subr.mxu0 %v1680_v1 }
 0x15a   : > { %747 = vmatprep.mubr.f32.mxu0 %v1680_v1  ;;  %1456 = vmatpush3.msra.mxu0 %v1979_v34  ;;  %v838_v34 = vld [vmem:[%s2227_s2 + $0x40] sm:$0xff] }
 0x15b   : > { %1457 = vmatprep.subr.mxu0 %v1680_v1  ;;  %1413 = vmatpush3.msra.mxu1 %v839_v31 }
 0x15c   : > { %1458 = vmatpush3.msra.mxu0 %v840_v28  ;;  %1414 = vmatprep.subr.mxu1 %v1680_v1 }
 0x15d   : > { %1327 = vmatmul.mubr.msk.f32.gmra.mxu0 %vm378_vm8, %v247_v25  ;;  %1459 = vmatprep.subr.mxu0 %v1680_v1 }
 0x15e   : > { %753 = vmatprep.mubr.f32.mxu0 %v1680_v1  ;;  %1460 = vmatpush3.msra.mxu0 %v839_v31 }
 0x15f   : > { %1461 = vmatprep.subr.mxu0 %v1680_v1  ;;  %1415 = vmatpush3.msra.mxu1 %v838_v34 }
 0x160   : > { %1462 = vmatpush3.msra.mxu0 %v838_v34  ;;  %1416 = vmatprep.subr.mxu1 %v1680_v1 }
 0x161   : > { %1328 = vmatmul.mubr.msk.f32.gmra.mxu0 %vm378_vm8, %v248_v26  ;;  %1463 = vmatprep.subr.mxu0 %v1680_v1  ;;  %vm1706_vm8 = vmmov 0  }
 0x162   : > { %1417 = vmatpush3.msra.mxu1 %v837_v6  ;;  %1464 = vmatpush3.msra.mxu0 %v837_v6 }
 0x163   : > { %1418 = vmatprep.subr.mxu1 %v1680_v1  ;;  %1465 = vmatprep.subr.mxu0 %v1680_v1 }
 0x164   : > { %1419 = vmatpush3.msra.mxu1 %v836_v9  ;;  %1466 = vmatpush3.msra.mxu0 %v836_v9 }
 0x165   : > { %1420 = vmatprep.subr.mxu1 %v1680_v1  ;;  %1467 = vmatprep.subr.mxu0 %v1680_v1 }
 0x166   : > { %1421 = vmatpush3.msra.mxu1 %v835_v10  ;;  %1468 = vmatpush3.msra.mxu0 %v835_v10 }
 0x167   : > { %1422 = vmatprep.subr.mxu1 %v1680_v1  ;;  %1469 = vmatprep.subr.mxu0 %v1680_v1 }
 0x168   : > { %1423 = vmatpush3.msra.mxu1 %v834_v11  ;;  %1470 = vmatpush3.msra.mxu0 %v834_v11 }
 0x169   : > { %1424 = vmatprep.subr.mxu1 %v1680_v1  ;;  %1471 = vmatprep.subr.mxu0 %v1680_v1 }
 0x16a   : > { %1425 = vmatpush3.msra.mxu1 %v833_v12  ;;  %1472 = vmatpush3.msra.mxu0 %v833_v12 }
 0x16b   : > { %1426 = vmatprep.subr.mxu1 %v1680_v1  ;;  %1473 = vmatprep.subr.mxu0 %v1680_v1 }
 0x16c   : > { %1427 = vmatpush3.msra.mxu1 %v832_v13  ;;  %1474 = vmatpush3.msra.mxu0 %v832_v13 }
 0x16d   : > { %1428 = vmatprep.subr.mxu1 %v1680_v1  ;;  %1475 = vmatprep.subr.mxu0 %v1680_v1 }
 0x16e   : > { %1429 = vmatpush3.msra.mxu1 %v831_v5  ;;  %1476 = vmatpush3.msra.mxu0 %v831_v5 }
 0x16f   : > { %1430 = vmatprep.subr.mxu1 %v1680_v1  ;;  %1477 = vmatprep.subr.mxu0 %v1680_v1 }
 0x170   : > { %1431 = vmatpush3.msra.mxu1 %v830_v14  ;;  %1432 = vmatprep.mubr.msk.f32.mxu1 %vm1706_vm8, %v1680_v1 }
 0x171   : > { %1478 = vmatpush3.msra.mxu0 %v830_v14  ;;  %1479 = vmatprep.mubr.msk.f32.mxu0 %vm1706_vm8, %v1680_v1 }
 0x172   : > { %1494 = vmatprep.subr.mxu1 %v1680_v1 }
 0x211   : > { %v731_v15 = vpop.f32.mrf.mxu0 }
 0x212   : > { %v770_v16 = vmin.f32 %v731_v15, 0.0  ;;  %vm760_vm10 = vcmp.gt.f32.partialorder %v731_v15, 0.0 }
 0x213   : > { %v733_v17 = vpop.f32.mrf.mxu0 }
 0x214   : > { %v780_v18 = vmul.f32 1.442695, %v770_v16  ;;  %v771_v19 = vmin.f32 %v733_v17, 0.0  ;;  %vm761_vm11 = vcmp.gt.f32.partialorder %v733_v17, 0.0 }
 0x215   : > { %v737_v3 = vpop.f32.mrf.mxu0 }
 0x216   : > { %1597 = vpow2.f32 %v780_v18  ;;  %v782_v20 = vmul.f32 1.442695, %v771_v19  ;;  %v772_v7 = vmin.f32 %v737_v3, 0.0  ;;  %vm762_vm12 = vcmp.gt.f32.partialorder %v737_v3, 0.0 }
 0x217   : > { %v739_v21 = vpop.f32.mrf.mxu0 }
 0x218   : > { %1599 = vpow2.f32 %v782_v20  ;;  %v784_v22 = vmul.f32 1.442695, %v772_v7  ;;  %v773_v23 = vmin.f32 %v739_v21, 0.0  ;;  %vm763_vm13 = vcmp.gt.f32.partialorder %v739_v21, 0.0 }
 0x219   : > { %v743_v24 = vpop.f32.mrf.mxu0 }
 0x21a   : > { %1601 = vpow2.f32 %v784_v22  ;;  %v786_v4 = vmul.f32 1.442695, %v773_v23  ;;  %v774_v8 = vmin.f32 %v743_v24, 0.0  ;;  %vm764_vm14 = vcmp.gt.f32.partialorder %v743_v24, 0.0 }
 0x21b   : > { %v745_v27 = vpop.f32.mrf.mxu0 }
 0x21c   : > { %1603 = vpow2.f32 %v786_v4  ;;  %v788_v1 = vmul.f32 1.442695, %v774_v8  ;;  %v775_v29 = vmin.f32 %v745_v27, 0.0  ;;  %vm765_vm15 = vcmp.gt.f32.partialorder %v745_v27, 0.0 }
 0x21d   : > { %v749_v30 = vpop.f32.mrf.mxu0 }
 0x21e   : > { %1605 = vpow2.f32 %v788_v1  ;;  %v790_v32 = vmul.f32 1.442695, %v775_v29  ;;  %v776_v33 = vmin.f32 %v749_v30, 0.0  ;;  %vm766_vm0 = vcmp.gt.f32.partialorder %v749_v30, 0.0 }
 0x21f   : > { %v751_v35 = vpop.f32.mrf.mxu0 }
 0x220   : > { %1607 = vpow2.f32 %v790_v32  ;;  %v792_v36 = vmul.f32 1.442695, %v776_v33  ;;  %v777_v37 = vmin.f32 %v751_v35, 0.0  ;;  %vm767_vm1 = vcmp.gt.f32.partialorder %v751_v35, 0.0 }
 0x221   : > { %v2080_v38 = vpop.f32.mrf.mxu0 }
 0x222   : > { %1609 = vpow2.f32 %v792_v36  ;;  %v794_v39 = vmul.f32 1.442695, %v777_v37  ;;  %v778_v40 = vmin.f32 %v2080_v38, 0.0  ;;  %vm768_vm2 = vcmp.gt.f32.partialorder %v2080_v38, 0.0  ;;  %v1098_v37 = vld [vmem:[%s2229_s4] sm:$0xff] }
 0x223   : > { %v1598_v41 = vpop.eup %1597  ;;  %v2083_v42 = vpop.f32.mrf.mxu0 }
 0x224   : > { %1611 = vpow2.f32 %v794_v39  ;;  %v796_v43 = vmul.f32 1.442695, %v778_v40  ;;  %v779_v44 = vmin.f32 %v2083_v42, 0.0  ;;  %v1329_v46 = vadd.f32 -1.0, %v1598_v41  ;;  %v1100_v40 = vld [vmem:[%s2229_s4 + $0x10] sm:$0xff]  ;;  %v1102_v41 = vld [vmem:[%s2229_s4 + $0x20] sm:$0xff] }
 0x225   : > { %v1600_v45 = vpop.eup %1599  ;;  %vm769_vm3 = vcmp.gt.f32.partialorder %v2083_v42, 0.0  ;;  %v1708_v39 = vmov 0  }
 0x226   : > { %v1330_v47 = vadd.f32 -1.0, %v1600_v45  ;;  %1613 = vpow2.f32 %v796_v43  ;;  %v798_v48 = vmul.f32 1.442695, %v779_v44  ;;  %v810_v50 = vsel %vm760_vm10, %v731_v15, %v1329_v46  ;;  %1591 = vset.pattern.permute.xlu1 %v1708_v39  ;;  %1592 = vset.pattern.permute.xlu0 %v1708_v39 }
 0x227   : > { %v1602_v49 = vpop.eup %1601  ;;  %1433 = vmatmul.mubr.f32.vlgmr.msra.gmra.mxu1 %v810_v50 }
 0x228   : > { %v811_v51 = vsel %vm761_vm11, %v733_v17, %v1330_v47  ;;  %1615 = vpow2.f32 %v798_v48  ;;  %v1331_v52 = vadd.f32 -1.0, %v1602_v49  ;;  %1435 = vmatprep.mubr.msk.f32.mxu1 %vm1706_vm8, %v2086_v54 }
 0x229   : > { %v1604_v53 = vpop.eup %1603  ;;  %1480 = vmatmul.mubr.f32.vlgmr.msra.gmra.mxu0 %v811_v51 }
 0x22a   : > { %v812_v55 = vsel %vm762_vm12, %v737_v3, %v1331_v52  ;;  %1482 = vmatprep.mubr.msk.f32.mxu0 %vm1706_vm8, %v2086_v54  ;;  %v1332_v56 = vadd.f32 -1.0, %v1604_v53 }
 0x22b   : > { %v1606_v57 = vpop.eup %1605  ;;  %1436 = vmatmul.mubr.f32.gmra.mxu1 %v812_v55 }
 0x22c   : > { %v813_v58 = vsel %vm763_vm13, %v739_v21, %v1332_v56  ;;  %v1333_v59 = vadd.f32 -1.0, %v1606_v57  ;;  %1438 = vmatprep.mubr.msk.f32.mxu1 %vm1706_vm8, %v2086_v54 }
 0x22d   : > { %v1608_v60 = vpop.eup %1607  ;;  %1483 = vmatmul.mubr.f32.gmra.mxu0 %v813_v58 }
 0x22e   : > { %v814_v61 = vsel %vm764_vm14, %v743_v24, %v1333_v59  ;;  %1485 = vmatprep.mubr.msk.f32.mxu0 %vm1706_vm8, %v2086_v54  ;;  %v1334_v62 = vadd.f32 -1.0, %v1608_v60 }
 0x22f   : > { %v1610_v63 = vpop.eup %1609  ;;  %1439 = vmatmul.mubr.f32.gmra.mxu1 %v814_v61 }
 0x230   : > { %v815_v0 = vsel %vm765_vm15, %v745_v27, %v1334_v62  ;;  %v1335_v2 = vadd.f32 -1.0, %v1610_v63  ;;  %1441 = vmatprep.mubr.msk.f32.mxu1 %vm1706_vm8, %v2086_v54  ;;  %v1088_v63 = vld [vmem:[%s2228_s3] sm:$0xff] }
 0x231   : > { %v1612_v25 = vpop.eup %1611  ;;  %1486 = vmatmul.mubr.f32.gmra.mxu0 %v815_v0 }
 0x232   : > { %v816_v26 = vsel %vm766_vm0, %v749_v30, %v1335_v2  ;;  %1488 = vmatprep.mubr.msk.f32.mxu0 %vm1706_vm8, %v2086_v54  ;;  %v1336_v28 = vadd.f32 -1.0, %v1612_v25  ;;  %v1089_v2 = vld [vmem:[%s2228_s3 + $0x8] sm:$0xff]  ;;  %v1090_v25 = vld [vmem:[%s2228_s3 + $0x10] sm:$0xff] }
 0x233   : > { %v1614_v31 = vpop.eup %1613  ;;  %1442 = vmatmul.mubr.f32.gmra.mxu1 %v816_v26  ;;  %v1091_v26 = vld [vmem:[%s2228_s3 + $0x18] sm:$0xff] }
 0x234   : > { %v817_v34 = vsel %vm767_vm1, %v751_v35, %v1336_v28  ;;  %v1337_v6 = vadd.f32 -1.0, %v1614_v31  ;;  %1444 = vmatprep.mubr.msk.f32.mxu1 %vm1706_vm8, %v2086_v54  ;;  %v1092_v28 = vld [vmem:[%s2228_s3 + $0x20] sm:$0xff] }
 0x235   : > { %v1616_v9 = vpop.eup %1615  ;;  %1489 = vmatmul.mubr.f32.gmra.mxu0 %v817_v34 }
 0x236   : > { %v818_v10 = vsel %vm768_vm2, %v2080_v38, %v1337_v6  ;;  %1491 = vmatprep.mubr.msk.f32.mxu0 %vm1706_vm8, %v2086_v54  ;;  %v1338_v11 = vadd.f32 -1.0, %v1616_v9  ;;  %v1099_v38 = vld [vmem:[%s2229_s4 + $0x8] sm:$0xff] }
 0x237   : > { %1445 = vmatmul.mubr.f32.gmra.mxu1 %v818_v10 }
 0x238   : > { %v819_v12 = vsel %vm769_vm3, %v2083_v42, %v1338_v11  ;;  %1504 = vmatprep.mubr.msk.f32.mxu1 %vm1706_vm8, %v2086_v54  ;;  %v1101_v42 = vld [vmem:[%s2229_s4 + $0x18] sm:$0xff] }
 0x239   : > { %1492 = vmatmul.mubr.f32.gmra.mxu0 %v819_v12 }
 0x2e7   : > { %v922_v13 = vpop.f32.mrf.mxu1 }
 0x2e8   : > { %v946_v5 = vadd.f32 %v2086_v54, %v922_v13 }
 0x2e9   : > { %v1033_v14 = vpop.f32.mrf.mxu0  ;;  %v1434_v15 = vpop.f32.mrf.mxu1 }
 0x2ea   : > { %952 = vst.msk [vmem:[#allocation4] sm:$0xff] %vm951_vm4, %v946_v5 }
 0x2eb   : > { %v1481_v16 = vpop.f32.mrf.mxu0  ;;  %v927_v17 = vpop.f32.mrf.mxu1 }
 0x2ec   : > { %v947_v18 = vadd.f32 %v2086_v54, %v927_v17 }
 0x2ed   : > { %v1038_v19 = vpop.f32.mrf.mxu0  ;;  %v1437_v3 = vpop.f32.mrf.mxu1 }
 0x2ee   : > { %953 = vst.msk [vmem:[#allocation4 + $0x8] sm:$0xff] %vm951_vm4, %v947_v18 }
 0x2ef   : > { %v1484_v20 = vpop.f32.mrf.mxu0  ;;  %v932_v7 = vpop.f32.mrf.mxu1 }
 0x2f0   : > { %v948_v21 = vadd.f32 %v2086_v54, %v932_v7 }
 0x2f1   : > { %v1043_v22 = vpop.f32.mrf.mxu0  ;;  %v1440_v23 = vpop.f32.mrf.mxu1  ;;  %v957_v56 = vld [vmem:[#allocation4] sm:$0xff] }
 0x2f2   : > { %954 = vst.msk [vmem:[#allocation4 + $0x10] sm:$0xff] %vm951_vm4, %v948_v21 }
 0x2f3   : > { %v1487_v24 = vpop.f32.mrf.mxu0  ;;  %v937_v4 = vpop.f32.mrf.mxu1 }
 0x2f4   : > { %v949_v8 = vadd.f32 %v2086_v54, %v937_v4 }
 0x2f5   : > { %v1048_v27 = vpop.f32.mrf.mxu0  ;;  %v1443_v1 = vpop.f32.mrf.mxu1  ;;  %v958_v46 = vld [vmem:[#allocation4 + $0x8] sm:$0xff] }
 0x2f6   : > { %1068 = vrot.lane.b32.xlu1 %v1048_v27, %s1707_s13  ;;  %955 = vst.msk [vmem:[#allocation4 + $0x18] sm:$0xff] %vm951_vm4, %v949_v8 }
 0x2f7   : > { %v1490_v29 = vpop.f32.mrf.mxu0  ;;  %v942_v30 = vpop.f32.mrf.mxu1 }
 0x2f8   : > { %v950_v32 = vadd.f32 %v2086_v54, %v942_v30 }
 0x2f9   : > { %v1053_v33 = vpop.f32.mrf.mxu0  ;;  %v1446_v35 = vpop.f32.mrf.mxu1  ;;  %v959_v52 = vld [vmem:[#allocation4 + $0x10] sm:$0xff] }
 0x2fa   : > { %1064 = vrot.lane.b32.xlu1 %v1038_v19, %s1707_s13  ;;  %1070 = vrot.lane.b32.xlu0 %v1053_v33, %s1707_s13  ;;  %956 = vst.msk [vmem:[#allocation4 + $0x20] sm:$0xff] %vm951_vm4, %v950_v32 }
 0x2fb   : > { %v1493_v36 = vpop.f32.mrf.mxu0 }
 0x2fd   : > { %v960_v43 = vld [vmem:[#allocation4 + $0x18] sm:$0xff] }
 0x2fe   : > { %1066 = vrot.lane.b32.xlu0 %v1043_v22, %s1707_s13  ;;  %1105 = vperm.xlu1 %1591, %v1098_v37  }
 0x301   : > { %v961_v48 = vld [vmem:[#allocation4 + $0x20] sm:$0xff] }
 0x302   : > { %1062 = vrot.lane.b32.xlu0 %v1033_v14, %s1707_s13  ;;  %1115 = vperm.xlu1 %1591, %v1100_v40   ;;  %s1624_s13 = scalar_lea.vmem %s1623_s12, 1280 }
 0x303   : > { %p1626_p1 = scmp.lt.s32.totalorder %s1624_s13, %s1618_s22 }
 0x305   : > { %p1627_p2 = por %p1626_p1, %p1625_p0 }
 0x306   : > { %1110 = vperm.xlu0 %1592, %v1099_v38   ;;  %1120 = vperm.xlu1 %1591, %v1101_v42  }
 0x307   : > { %p1628_p3 = pnand %p1627_p2, %p1621_p13 }
 0x30a   : > { %1125 = vperm.xlu0 %1592, %v1102_v41  }
 0x368   : > { %v1069_v44 = vpop.permute.xlu1 %1068 }
 0x369   : > { %v1080_v45 = vadd.f32 %v1069_v44, %v960_v43 }
 0x36b   : > { %1086 = vst.msk [vmem:[#allocation4 + $0x18] sm:$0xff] %vm1082_vm5, %v1080_v45 }
 0x36c   : > { %v1065_v47 = vpop.permute.xlu1 %1064  ;;  %v1071_v49 = vpop.permute.xlu0 %1070 }
 0x36d   : > { %v1078_v50 = vadd.f32 %v1065_v47, %v958_v46  ;;  %v1081_v51 = vadd.f32 %v1071_v49, %v961_v48 }
 0x36f   : > { %1084 = vst.msk [vmem:[#allocation4 + $0x8] sm:$0xff] %vm1082_vm5, %v1078_v50  ;;  %1087 = vst.msk [vmem:[#allocation4 + $0x20] sm:$0xff] %vm1082_vm5, %v1081_v51 }
 0x370   : > { %v1067_v53 = vpop.permute.xlu0 %1066 }
 0x371   : > { %v1079_v55 = vadd.f32 %v1067_v53, %v959_v52 }
 0x372   : > { %v1096_v60 = vld [vmem:[#allocation4 + $0x18] sm:$0xff] }
 0x373   : > { %1085 = vst.msk [vmem:[#allocation4 + $0x10] sm:$0xff] %vm1082_vm5, %v1079_v55 }
 0x374   : > { %v1063_v57 = vpop.permute.xlu0 %1062 }
 0x375   : > { %v1077_v58 = vadd.f32 %v1063_v57, %v957_v56 }
 0x376   : > { %v1097_v59 = vld [vmem:[#allocation4 + $0x20] sm:$0xff]  ;;  %v1094_v62 = vld [vmem:[#allocation4 + $0x8] sm:$0xff] }
 0x377   : > { %1083 = vst.msk [vmem:[#allocation4] sm:$0xff] %vm1082_vm5, %v1077_v58  ;;  %1495 = vmatpush3.msra.mxu1 %v1097_v59 }
 0x378   : > { %1496 = vmatprep.subr.mxu1 %v2086_v54 }
 0x379   : > { %1497 = vmatpush3.msra.mxu1 %v1096_v60  ;;  %v1106_v31 = vpop.permute.xlu1 %1105 }
 0x37a   : > { %1498 = vmatprep.subr.mxu1 %v2086_v54  ;;  %v1095_v61 = vld [vmem:[#allocation4 + $0x10] sm:$0xff] }
 0x37b   : > { %1499 = vmatpush3.msra.mxu1 %v1095_v61 }
 0x37c   : > { %1500 = vmatprep.subr.mxu1 %v2086_v54 }
 0x37d   : > { %1501 = vmatpush3.msra.mxu1 %v1094_v62  ;;  %v1116_v13 = vpop.permute.xlu1 %1115 }
 0x37e   : > { %1502 = vmatprep.subr.mxu1 %v2086_v54  ;;  %v1093_v0 = vld [vmem:[#allocation4] sm:$0xff] }
 0x37f   : > { %1503 = vmatpush3.msra.mxu1 %v1093_v0 }
 0x380   : > { %1505 = vmatmul.mubr.msk.f32.vlgmr.msra.gmra.mxu1 %vm1128_vm6, %v1088_v63 }
 0x381   : > { %1507 = vmatprep.mubr.msk.f32.mxu1 %vm1706_vm8, %v2086_v54  ;;  %v1111_v10 = vpop.permute.xlu0 %1110  ;;  %v1121_v16 = vpop.permute.xlu1 %1120 }
 0x384   : > { %1508 = vmatmul.mubr.msk.f32.gmra.mxu1 %vm1128_vm6, %v1089_v2 }
 0x385   : > { %1510 = vmatprep.mubr.msk.f32.mxu1 %vm1706_vm8, %v2086_v54  ;;  %v1126_v20 = vpop.permute.xlu0 %1125 }
 0x388   : > { %1511 = vmatmul.mubr.msk.f32.gmra.mxu1 %vm1128_vm6, %v1090_v25 }
 0x389   : > { %1513 = vmatprep.mubr.msk.f32.mxu1 %vm1706_vm8, %v2086_v54 }
 0x38c   : > { %1514 = vmatmul.mubr.msk.f32.gmra.mxu1 %vm1128_vm6, %v1091_v26 }
 0x38d   : > { %1516 = vmatprep.mubr.msk.f32.mxu1 %vm1706_vm8, %v2086_v54 }
 0x390   : > { %1517 = vmatmul.mubr.msk.f32.gmra.mxu1 %vm1128_vm6, %v1092_v28 }
 0x440   : > { %v1210_v34 = vpop.f32.mrf.mxu1 }
 0x441   : > { %v1211_v6 = vadd.f32 %v1210_v34, %v1106_v31 }
 0x442   : > { %v1506_v9 = vpop.f32.mrf.mxu1 }
 0x443   : > { %1234 = vst [vmem:[%s220_s26] sm:$0xff] %v1211_v6 }
 0x444   : > { %v1215_v11 = vpop.f32.mrf.mxu1 }
 0x445   : > { %v1216_v12 = vadd.f32 %v1215_v11, %v1111_v10 }
 0x446   : > { %v1509_v54 = vpop.f32.mrf.mxu1 }
 0x447   : > { %1235 = vst [vmem:[%s220_s26 + $0x8] sm:$0xff] %v1216_v12 }
 0x448   : > { %v1220_v5 = vpop.f32.mrf.mxu1 }
 0x449   : > { %v1221_v14 = vadd.f32 %v1220_v5, %v1116_v13 }
 0x44a   : > { %v1512_v15 = vpop.f32.mrf.mxu1 }
 0x44b   : > { %1236 = vst [vmem:[%s220_s26 + $0x10] sm:$0xff] %v1221_v14 }
 0x44c   : > { %v1225_v17 = vpop.f32.mrf.mxu1 }
 0x44d   : > { %v1226_v18 = vadd.f32 %v1225_v17, %v1121_v16 }
 0x44e   : > { %v1515_v19 = vpop.f32.mrf.mxu1 }
 0x44f   : > { %1237 = vst [vmem:[%s220_s26 + $0x18] sm:$0xff] %v1226_v18 }
 0x450   : > { %v1230_v3 = vpop.f32.mrf.mxu1 }
 0x451   : > { %v1231_v7 = vadd.f32 %v1230_v3, %v1126_v20 }
 0x452   : > { %v1518_v21 = vpop.f32.mrf.mxu1 }
 0x453   : > { %1238 = vst [vmem:[%s220_s26 + $0x20] sm:$0xff] %v1231_v7 }
 0x454   : > { %1631 = shalt.err (!%p1628_p3)
}
 0x455   : > { %s1632_s14 = scalar_lea.hbm %s2181_s9, 640  ;;  %s1636_s17 = scalar_lea.hbm %s2230_s5, 1280 }
 0x456   : > { %p1633_p4 = scmp.ne.s32.totalorder %s2181_s9, %s1632_s14  ;;  %p1637_p9 = scmp.lt.s32.totalorder %s2181_s9, %s2230_s5 }
 0x457   : > { %p1638_p10 = scmp.lt.s32.totalorder %s1636_s17, %s1632_s14 }
 0x458   : > { %p1634_p7 = pnand %p1633_p4, %p1780_p5 }
 0x459   : > { %p1639_p11 = por %p1638_p10, %p1637_p9 }
 0x45a   : > { %p1635_p8 = pneg %p1634_p7 }
 0x45c   : > { %p1640_p12 = pnand %p1639_p11, %p1635_p8 }
 0x45e   : > { %1643 = shalt.err (!%p1640_p12)
}
 0x45f   : > { %s1710_s26 = smov 128   ;;  %s1711_s6 = smov 8  }
 0x460   : > { %1521 = dma.vmem_to_hbm [thread:$0]  (%p1780_p5), %s2176_s30, 640, %s2181_s9, %s2185_s10, %s1710_s26, %s1710_s26, %s1711_s6  }
 0x461 PF: > { %p1527_p13 = scmp.ge.s32.totalorder %s1678_s21, 2  ;;  %s1268_s7 = sand.u32 1, %s1666_s18  }
 0x462   : > { %s1269_s8 = scalar_lea.sflag [#allocation6], %s1268_s7 }
 0x463   : > { %p1524_p0 = pnand %p1527_p13, %p1784_p6 }
 0x465   : > { %p1525_p1 = pneg %p1524_p0 }
 0x467   : > { %1661 = dma.done.wait (%p1525_p1), %s1269_s8, 640  }
 0x468   : > { %1663 = vsyncadd (%p1525_p1), %s1269_s8, 4294966656  ;;  %p15_p2 = scmp.ge.s32.totalorder %s1767_s24, 4   ;;  %s2234_s18 = smov %s1670_s19 }
 0x469   : > { %s2235_s19 = smov %s1674_s20  ;;  %s2236_s20 = smov %s1778_s27 }
 0x46a   : > { %s2237_s21 = smov %s1767_s24  ;;  %17 = sbr.rel (!%p15_p2) target bundleno = 3 (0x3), region = 77 }
 0x46f   :  { %1274 = vsyncpa [#allocation6], 1 }
 0x470   :  { %1276 = vsyncpa [#allocation6 + $0x1], 1 }

</bundles_post_ra>
